<compile_context>
chip_gen: v7x
topology: tpu7x:2x2x1
jax: 0.10.0
libtpu: 0.0.40
codegen_flags: <defaults>
</compile_context>

<pallas_src>
import functools

import jax
import jax.numpy as jnp
from jax.experimental import pallas as pl
from jax.experimental.pallas import tpu as pltpu

OUT_PAD = 128  # lane-dense padded width for the 2-wide repeat/explore output


def _round_up(x, m):
    return (x + m - 1) // m * m


def _vmem_info():
    """(data-tile budget, vmem_limit_bytes) derived from this chip's VMEM."""
    try:
        cap = int(pltpu.get_tpu_info().vmem_capacity_bytes)
    except Exception:
        cap = 64 * 2**20  # assume the smallest budget (v7x per-TensorCore VMEM)
    budget = min(int(cap * 0.35), 40 * 2**20)          # streamed-tile budget
    limit = max(32 * 2**20, min(cap - 16 * 2**20, 96 * 2**20))
    return budget, limit


def _choose_tiles(B, S, H, vmem_budget_bytes):
    """VMEM-aware batch tile TB and sequence chunk SC (both layout aligned)."""
    s16 = _round_up(S, 16)                             # bf16 sublane packing
    # Batch tile: largest candidate whose double-buffered bf16 all_memory block
    # stays within ~40% of the budget.
    tb = 8
    for cand in (128, 64, 32, 16, 8):
        if 2 * cand * s16 * H * 2 <= int(0.4 * vmem_budget_bytes):
            tb = cand
            break
    tb = min(tb, _round_up(B, 8))
    # Keep >=2 grid steps when the batch is big enough (v7x has 2 TensorCores).
    if _round_up(B, tb) // tb < 2 and B >= 16:
        tb = max(8, _round_up(tb // 2, 8))
    # Sequence chunk: multiple of 16 (free bf16 sublane merge feeding the MXU),
    # keeping the ~4 chunk-sized f32 intermediates within ~35% of the budget.
    sc = 16
    for cand in (512, 256, 128, 64, 32, 16):
        if cand <= s16 and 4 * tb * cand * H * 4 <= int(0.35 * vmem_budget_bytes):
            sc = cand
            break
    sc = min(sc, s16)
    return tb, sc, _round_up(B, tb), _round_up(S, sc)


def repeat_explore_kernel(all_mem_ref, last_mem_ref, ure_ref, wre_ref,
                          vre_ref, wcre_ref, out_ref, *, s_valid, s_chunk):
    TB, S_pad, H = all_mem_ref.shape
    OUTP = out_ref.shape[1]
    n_chunks = S_pad // s_chunk

    # Wre(last_memory): bf16 MXU matmul, f32 accumulation.
    proj_last = jnp.dot(last_mem_ref[...], wre_ref[...],
                        preferred_element_type=jnp.float32)          # (TB, H) f32
    proj_last_b = proj_last[:, None, :]                              # hoisted
    vre_row = vre_ref[...].astype(jnp.float32)                       # (1, H)

    def chunk_body(c, carry):
        m_i, l_i, ctx = carry
        start = c * s_chunk
        if not isinstance(start, int):
            start = pl.multiple_of(start, s_chunk)
        am = all_mem_ref[:, pl.ds(start, s_chunk), :]                # (TB, SC, H) bf16
        # Ure(all_memory) chunk: merge (TB, SC) rows -> one MXU matmul with a
        # large M dim; SC is a multiple of 16 so the merge is a free relayout.
        proj = jnp.dot(am.reshape(TB * s_chunk, H), ure_ref[...],
                       preferred_element_type=jnp.float32)
        er = jnp.tanh(proj.reshape(TB, s_chunk, H) + proj_last_b)    # (TB, SC, H) f32
        # Vre(er): width-1 linear -> VPU multiply + lane reduction (no 1-lane MXU).
        s = jnp.sum(er * vre_row[None, :, :], axis=-1)               # (TB, SC) f32
        # Mask padded sequence positions before the softmax.
        pos = start + jax.lax.broadcasted_iota(jnp.int32, (TB, s_chunk), 1)
        s = jnp.where(pos < s_valid, s, jnp.float32(-1e30))
        # Online (streaming) stable softmax + context accumulation.
        m_new = jnp.maximum(m_i, jnp.max(s, axis=-1, keepdims=True))
        scale = jnp.exp(m_i - m_new)
        p = jnp.exp(s - m_new)                                       # (TB, SC)
        l_new = scale * l_i + jnp.sum(p, axis=-1, keepdims=True)
        ctx_new = scale * ctx + jnp.sum(p[:, :, None] * am.astype(jnp.float32),
                                        axis=1)                      # (TB, H)
        return m_new, l_new, ctx_new

    init = (jnp.full((TB, 1), -1e30, jnp.float32),
            jnp.zeros((TB, 1), jnp.float32),
            jnp.zeros((TB, H), jnp.float32))
    if n_chunks == 1:
        m_i, l_i, ctx = chunk_body(0, init)           # straight-line, fully static
    else:
        m_i, l_i, ctx = jax.lax.fori_loop(0, n_chunks, chunk_body, init)

    ctx = ctx / l_i                                                  # alpha-normalized

    # Wcre(ctx): width-2 linear -> two VPU reductions + 2-way stable softmax.
    wcre = wcre_ref[...].astype(jnp.float32)                          # (2, H)
    lg0 = jnp.sum(ctx * wcre[0:1, :], axis=-1, keepdims=True)         # (TB, 1)
    lg1 = jnp.sum(ctx * wcre[1:2, :], axis=-1, keepdims=True)         # (TB, 1)
    mm = jnp.maximum(lg0, lg1)
    e0 = jnp.exp(lg0 - mm)
    e1 = jnp.exp(lg1 - mm)
    inv = 1.0 / (e0 + e1)

    # Lane-dense padded store: col 0 = P(repeat), col 1 = P(explore), rest 0.
    lane = jax.lax.broadcasted_iota(jnp.int32, (TB, OUTP), 1)
    out_ref[...] = jnp.where(lane == 0, e0 * inv,
                             jnp.where(lane == 1, e1 * inv, jnp.float32(0.0)))


def repeat_explore_mechanism(all_memory, last_memory, ure, wre, vre_w, wcre_w):
    """ure/wre stored (in, out); vre_w (1, H) and wcre_w (2, H) in PyTorch layout."""
    B, S, H = all_memory.shape
    budget, vmem_limit = _vmem_info()
    tb, sc, b_pad, s_pad = _choose_tiles(B, S, H, budget)

    cdt = jnp.bfloat16
    am = all_memory.astype(cdt)
    lm = last_memory.astype(cdt)
    if b_pad != B or s_pad != S:
        am = jnp.pad(am, ((0, b_pad - B), (0, s_pad - S), (0, 0)))
    if b_pad != B:
        lm = jnp.pad(lm, ((0, b_pad - B), (0, 0)))

    kernel = functools.partial(repeat_explore_kernel, s_valid=S, s_chunk=sc)
    args = (am, lm, ure.astype(cdt), wre.astype(cdt),
            vre_w.astype(cdt), wcre_w.astype(cdt))

    def build(single_buffer_weights):
        if single_buffer_weights:
            def wspec(shape):   # grid-invariant weights: fetch once, one buffer
                return pl.BlockSpec(shape, lambda b: (0,) * len(shape),
                                    pipeline_mode=pl.Buffered(1))
        else:
            def wspec(shape):
                return pl.BlockSpec(shape, lambda b: (0,) * len(shape))
        grid_spec = pltpu.PrefetchScalarGridSpec(
            num_scalar_prefetch=0,
            grid=(b_pad // tb,),
            in_specs=[
                pl.BlockSpec((tb, s_pad, H), lambda b: (b, 0, 0)),   # all_memory
                pl.BlockSpec((tb, H), lambda b: (b, 0)),             # last_memory
                wspec((H, H)),                                       # Ure (in, out)
                wspec((H, H)),                                       # Wre (in, out)
                wspec((1, H)),                                       # Vre  (1, H)
                wspec((2, H)),                                       # Wcre (2, H)
            ],
            out_specs=pl.BlockSpec((tb, OUT_PAD), lambda b: (b, 0)),
        )
        return pl.pallas_call(
            kernel,
            out_shape=jax.ShapeDtypeStruct((b_pad, OUT_PAD), jnp.float32),
            grid_spec=grid_spec,
            compiler_params=pltpu.CompilerParams(
                dimension_semantics=("parallel",),
                vmem_limit_bytes=int(vmem_limit)),
        )

    try:
        out_padded = build(True)(*args)
    except Exception:
        # pl.Buffered(1) not accepted by this jax version: fall back to the
        # default double-buffered weight specs (identical numerics).
        out_padded = build(False)(*args)

    return out_padded[:B, :2]


def reference(all_memory, last_memory, ure, wre, vre_w, wcre_w):
    proj_all = jnp.einsum('bsh,hk->bsk', all_memory, ure)
    proj_last = last_memory @ wre
    er = jnp.tanh(proj_all + proj_last[:, None, :])
    scores = jnp.einsum('bsh,h->bs', er, vre_w[0])
    alpha = jax.nn.softmax(scores, axis=-1)
    ctx = jnp.einsum('bs,bsh->bh', alpha, all_memory)
    logits = ctx @ wcre_w.T
    return jax.nn.softmax(logits, axis=-1)


if __name__ == "__main__":
    B, S, H = 2, 8, 32   # batch, seq_len, hidden_size

    key = jax.random.PRNGKey(0)
    k_am, k_lm, k_ure, k_wre, k_vre, k_wcre = jax.random.split(key, 6)
    scale = 1.0 / (H ** 0.5)

    # Generate in f32, round once to bf16 so the kernel (bf16 streaming) and the
    # f32 in-script reference see identical inputs.
    all_memory = jax.random.normal(k_am, (B, S, H), jnp.float32).astype(jnp.bfloat16)
    last_memory = jax.random.normal(k_lm, (B, H), jnp.float32).astype(jnp.bfloat16)
    Ure = (jax.random.normal(k_ure, (H, H), jnp.float32) * scale).astype(jnp.bfloat16)      # (in, out)
    Wre = (jax.random.normal(k_wre, (H, H), jnp.float32) * scale).astype(jnp.bfloat16)      # (in, out)
    Vre_w = (jax.random.normal(k_vre, (1, H), jnp.float32) * scale).astype(jnp.bfloat16)    # PyTorch (out=1, in)
    Wcre_w = (jax.random.normal(k_wcre, (2, H), jnp.float32) * scale).astype(jnp.bfloat16)  # PyTorch (out=2, in)

    # TODO(synk): nn.Dropout is treated as identity (inference semantics).
    out = repeat_explore_mechanism(all_memory, last_memory, Ure, Wre, Vre_w, Wcre_w)
    out = jax.block_until_ready(out)

    ref = reference(all_memory.astype(jnp.float32), last_memory.astype(jnp.float32),
                    Ure.astype(jnp.float32), Wre.astype(jnp.float32),
                    Vre_w.astype(jnp.float32), Wcre_w.astype(jnp.float32))

    assert out.shape == (B, 2)
    assert bool(jnp.all(jnp.isfinite(out))), "non-finite output"
    assert jnp.allclose(out, ref, atol=1e-3, rtol=1e-3), "mismatch vs reference"
    assert jnp.allclose(jnp.sum(out, axis=-1), 1.0, atol=1e-5), "rows must sum to 1"

    print("KERNEL_OK")
</pallas_src>

<mosaic_0001>
module attributes {stable_mosaic.version = 11 : i64} {
  func.func @repeat_explore_kernel(%arg0: i32, %arg1: memref<8x16x32xbf16, #tpu.memory_space<vmem>>, %arg2: memref<8x32xbf16, #tpu.memory_space<vmem>>, %arg3: memref<32x32xbf16, #tpu.memory_space<vmem>>, %arg4: memref<32x32xbf16, #tpu.memory_space<vmem>>, %arg5: memref<1x32xbf16, #tpu.memory_space<vmem>>, %arg6: memref<2x32xbf16, #tpu.memory_space<vmem>>, %arg7: memref<8x128xf32, #tpu.memory_space<vmem>>) attributes {dimension_semantics = [#tpu.dimension_semantics<parallel>], iteration_bounds = array<i64: 1>, scalar_prefetch = 0 : i64, scratch_operands = 0 : i64, tpu.core_type = #tpu.core_type<tc>, window_params = [{transform_indices = @transform_0, window_bounds = array<i64: 8, 16, 32>}, {transform_indices = @transform_1, window_bounds = array<i64: 8, 32>}, {pipeline_mode = #tpu.pipeline_mode<synchronous>, transform_indices = @transform_2, window_bounds = array<i64: 32, 32>}, {pipeline_mode = #tpu.pipeline_mode<synchronous>, transform_indices = @transform_3, window_bounds = array<i64: 32, 32>}, {pipeline_mode = #tpu.pipeline_mode<synchronous>, transform_indices = @transform_4, window_bounds = array<i64: 1, 32>}, {pipeline_mode = #tpu.pipeline_mode<synchronous>, transform_indices = @transform_5, window_bounds = array<i64: 2, 32>}, {transform_indices = @transform_6, window_bounds = array<i64: 8, 128>}]} {
    %c0 = arith.constant 0 : index
    %c0_0 = arith.constant 0 : index
    %0 = vector.load %arg2[%c0, %c0_0] : memref<8x32xbf16, #tpu.memory_space<vmem>>, vector<8x32xbf16>
    %c0_1 = arith.constant 0 : index
    %c0_2 = arith.constant 0 : index
    %1 = vector.load %arg4[%c0_1, %c0_2] : memref<32x32xbf16, #tpu.memory_space<vmem>>, vector<32x32xbf16>
    %cst = arith.constant dense<0.000000e+00> : vector<8x32xf32>
    %2 = tpu.matmul %0, %1, %cst {dimension_numbers = #tpu.dot_dimension_numbers<[1], [0], [0], [1], [0, 0, 1, 1], [], []>} : vector<8x32xbf16>, vector<32x32xbf16>, vector<8x32xf32> -> vector<8x32xf32>
    %3 = vector.shape_cast %2 : vector<8x32xf32> to vector<8x1x32xf32>
    %c0_3 = arith.constant 0 : index
    %c0_4 = arith.constant 0 : index
    %4 = vector.load %arg5[%c0_3, %c0_4] : memref<1x32xbf16, #tpu.memory_space<vmem>>, vector<1x32xbf16>
    %5 = arith.extf %4 : vector<1x32xbf16> to vector<1x32xf32>
    %cst_5 = arith.constant -1.000000e+30 : f32
    %6 = vector.broadcast %cst_5 : f32 to vector<8x1xf32>
    %cst_6 = arith.constant 0.000000e+00 : f32
    %7 = vector.broadcast %cst_6 : f32 to vector<8x1xf32>
    %cst_7 = arith.constant 0.000000e+00 : f32
    %8 = vector.broadcast %cst_7 : f32 to vector<8x32xf32>
    %c0_8 = arith.constant 0 : index
    %c0_9 = arith.constant 0 : index
    %c0_10 = arith.constant 0 : index
    %9 = vector.load %arg1[%c0_8, %c0_9, %c0_10] : memref<8x16x32xbf16, #tpu.memory_space<vmem>>, vector<8x16x32xbf16>
    %10 = vector.shape_cast %9 : vector<8x16x32xbf16> to vector<128x32xbf16>
    %c0_11 = arith.constant 0 : index
    %c0_12 = arith.constant 0 : index
    %11 = vector.load %arg3[%c0_11, %c0_12] : memref<32x32xbf16, #tpu.memory_space<vmem>>, vector<32x32xbf16>
    %cst_13 = arith.constant dense<0.000000e+00> : vector<128x32xf32>
    %12 = tpu.matmul %10, %11, %cst_13 {dimension_numbers = #tpu.dot_dimension_numbers<[1], [0], [0], [1], [0, 0, 1, 1], [], []>} : vector<128x32xbf16>, vector<32x32xbf16>, vector<128x32xf32> -> vector<128x32xf32>
    %13 = vector.shape_cast %12 : vector<128x32xf32> to vector<8x16x32xf32>
    %14 = vector.broadcast %3 : vector<8x1x32xf32> to vector<8x16x32xf32>
    %15 = arith.addf %13, %14 : vector<8x16x32xf32>
    %16 = math.tanh %15 : vector<8x16x32xf32>
    %17 = vector.shape_cast %5 : vector<1x32xf32> to vector<1x1x32xf32>
    %18 = vector.broadcast %17 : vector<1x1x32xf32> to vector<8x16x32xf32>
    %19 = arith.mulf %16, %18 : vector<8x16x32xf32>
    %cst_14 = arith.constant dense<0.000000e+00> : vector<8x16xf32>
    %20 = vector.multi_reduction <add>, %19, %cst_14 [2] : vector<8x16x32xf32> to vector<8x16xf32>
    %21 = tpu.iota {dimensions = array<i32: 1>} : vector<8x16xi32>
    %c0_i32 = arith.constant 0 : i32
    %22 = vector.broadcast %c0_i32 : i32 to vector<8x16xi32>
    %23 = arith.addi %22, %21 : vector<8x16xi32>
    %c8_i32 = arith.constant 8 : i32
    %24 = vector.broadcast %c8_i32 : i32 to vector<8x16xi32>
    %25 = arith.cmpi slt, %23, %24 : vector<8x16xi32>
    %cst_15 = arith.constant -1.000000e+30 : f32
    %26 = vector.broadcast %cst_15 : f32 to vector<8x16xf32>
    %27 = arith.select %25, %20, %26 : vector<8x16xi1>, vector<8x16xf32>
    %cst_16 = arith.constant dense<0xFF800000> : vector<8xf32>
    %28 = vector.multi_reduction <maximumf>, %27, %cst_16 [1] : vector<8x16xf32> to vector<8xf32>
    %29 = vector.shape_cast %28 : vector<8xf32> to vector<8x1xf32>
    %30 = arith.maximumf %6, %29 : vector<8x1xf32>
    %31 = arith.subf %6, %30 : vector<8x1xf32>
    %32 = math.exp %31 : vector<8x1xf32>
    %33 = vector.broadcast %30 : vector<8x1xf32> to vector<8x16xf32>
    %34 = arith.subf %27, %33 : vector<8x16xf32>
    %35 = math.exp %34 : vector<8x16xf32>
    %36 = arith.mulf %32, %7 : vector<8x1xf32>
    %cst_17 = arith.constant dense<0.000000e+00> : vector<8xf32>
    %37 = vector.multi_reduction <add>, %35, %cst_17 [1] : vector<8x16xf32> to vector<8xf32>
    %38 = vector.shape_cast %37 : vector<8xf32> to vector<8x1xf32>
    %39 = arith.addf %36, %38 : vector<8x1xf32>
    %40 = vector.broadcast %32 : vector<8x1xf32> to vector<8x32xf32>
    %41 = arith.mulf %40, %8 : vector<8x32xf32>
    %42 = vector.shape_cast %35 : vector<8x16xf32> to vector<8x16x1xf32>
    %43 = arith.extf %9 : vector<8x16x32xbf16> to vector<8x16x32xf32>
    %44 = vector.broadcast %42 : vector<8x16x1xf32> to vector<8x16x32xf32>
    %45 = arith.mulf %44, %43 : vector<8x16x32xf32>
    %cst_18 = arith.constant dense<0.000000e+00> : vector<8x32xf32>
    %46 = vector.multi_reduction <add>, %45, %cst_18 [1] : vector<8x16x32xf32> to vector<8x32xf32>
    %47 = arith.addf %41, %46 : vector<8x32xf32>
    %48 = vector.broadcast %39 : vector<8x1xf32> to vector<8x32xf32>
    %49 = arith.divf %47, %48 : vector<8x32xf32>
    %c0_19 = arith.constant 0 : index
    %c0_20 = arith.constant 0 : index
    %50 = vector.load %arg6[%c0_19, %c0_20] : memref<2x32xbf16, #tpu.memory_space<vmem>>, vector<2x32xbf16>
    %51 = arith.extf %50 : vector<2x32xbf16> to vector<2x32xf32>
    %52 = vector.extract_strided_slice %51 {offsets = [0, 0], sizes = [1, 32], strides = [1, 1]} : vector<2x32xf32> to vector<1x32xf32>
    %53 = vector.broadcast %52 : vector<1x32xf32> to vector<8x32xf32>
    %54 = arith.mulf %49, %53 : vector<8x32xf32>
    %cst_21 = arith.constant dense<0.000000e+00> : vector<8xf32>
    %55 = vector.multi_reduction <add>, %54, %cst_21 [1] : vector<8x32xf32> to vector<8xf32>
    %56 = vector.shape_cast %55 : vector<8xf32> to vector<8x1xf32>
    %57 = vector.extract_strided_slice %51 {offsets = [1, 0], sizes = [1, 32], strides = [1, 1]} : vector<2x32xf32> to vector<1x32xf32>
    %58 = vector.broadcast %57 : vector<1x32xf32> to vector<8x32xf32>
    %59 = arith.mulf %49, %58 : vector<8x32xf32>
    %cst_22 = arith.constant dense<0.000000e+00> : vector<8xf32>
    %60 = vector.multi_reduction <add>, %59, %cst_22 [1] : vector<8x32xf32> to vector<8xf32>
    %61 = vector.shape_cast %60 : vector<8xf32> to vector<8x1xf32>
    %62 = arith.maximumf %56, %61 : vector<8x1xf32>
    %63 = arith.subf %56, %62 : vector<8x1xf32>
    %64 = math.exp %63 : vector<8x1xf32>
    %65 = arith.subf %61, %62 : vector<8x1xf32>
    %66 = math.exp %65 : vector<8x1xf32>
    %67 = arith.addf %64, %66 : vector<8x1xf32>
    %cst_23 = arith.constant 1.000000e+00 : f32
    %68 = vector.broadcast %cst_23 : f32 to vector<8x1xf32>
    %69 = arith.divf %68, %67 : vector<8x1xf32>
    %70 = tpu.iota {dimensions = array<i32: 1>} : vector<8x128xi32>
    %c0_i32_24 = arith.constant 0 : i32
    %71 = vector.broadcast %c0_i32_24 : i32 to vector<8x128xi32>
    %72 = arith.cmpi eq, %70, %71 : vector<8x128xi32>
    %73 = arith.mulf %64, %69 : vector<8x1xf32>
    %c1_i32 = arith.constant 1 : i32
    %74 = vector.broadcast %c1_i32 : i32 to vector<8x128xi32>
    %75 = arith.cmpi eq, %70, %74 : vector<8x128xi32>
    %76 = arith.mulf %66, %69 : vector<8x1xf32>
    %cst_25 = arith.constant 0.000000e+00 : f32
    %77 = vector.shape_cast %76 : vector<8x1xf32> to vector<8x1xf32>
    %78 = vector.broadcast %77 : vector<8x1xf32> to vector<8x128xf32>
    %79 = vector.broadcast %cst_25 : f32 to vector<8x128xf32>
    %80 = arith.select %75, %78, %79 : vector<8x128xi1>, vector<8x128xf32>
    %81 = vector.shape_cast %73 : vector<8x1xf32> to vector<8x1xf32>
    %82 = vector.broadcast %81 : vector<8x1xf32> to vector<8x128xf32>
    %83 = arith.select %72, %82, %80 : vector<8x128xi1>, vector<8x128xf32>
    %c0_26 = arith.constant 0 : index
    %c0_27 = arith.constant 0 : index
    %84 = vector.load %arg7[%c0_26, %c0_27] : memref<8x128xf32, #tpu.memory_space<vmem>>, vector<8x128xf32>
    tpu.vector_store %arg7[%c0_26, %c0_27], %83 {strides = array<i32>} : memref<8x128xf32, #tpu.memory_space<vmem>>, vector<8x128xf32>,
    return
  }
  func.func @transform_0(%arg0: i32) -> (i32, i32, i32) {
    %c0_i32 = arith.constant 0 : i32
    %c0_i32_0 = arith.constant 0 : i32
    %c0_i32_1 = arith.constant 0 : i32
    return %arg0, %c0_i32, %c0_i32_0 : i32, i32, i32
  }
  func.func @transform_1(%arg0: i32) -> (i32, i32) {
    %c0_i32 = arith.constant 0 : i32
    %c0_i32_0 = arith.constant 0 : i32
    return %arg0, %c0_i32 : i32, i32
  }
  func.func @transform_2(%arg0: i32) -> (i32, i32) {
    %c0_i32 = arith.constant 0 : i32
    %c0_i32_0 = arith.constant 0 : i32
    %c0_i32_1 = arith.constant 0 : i32
    return %c0_i32, %c0_i32_0 : i32, i32
  }
  func.func @transform_3(%arg0: i32) -> (i32, i32) {
    %c0_i32 = arith.constant 0 : i32
    %c0_i32_0 = arith.constant 0 : i32
    %c0_i32_1 = arith.constant 0 : i32
    return %c0_i32, %c0_i32_0 : i32, i32
  }
  func.func @transform_4(%arg0: i32) -> (i32, i32) {
    %c0_i32 = arith.constant 0 : i32
    %c0_i32_0 = arith.constant 0 : i32
    %c0_i32_1 = arith.constant 0 : i32
    return %c0_i32, %c0_i32_0 : i32, i32
  }
  func.func @transform_5(%arg0: i32) -> (i32, i32) {
    %c0_i32 = arith.constant 0 : i32
    %c0_i32_0 = arith.constant 0 : i32
    %c0_i32_1 = arith.constant 0 : i32
    return %c0_i32, %c0_i32_0 : i32, i32
  }
  func.func @transform_6(%arg0: i32) -> (i32, i32) {
    %c0_i32 = arith.constant 0 : i32
    %c0_i32_0 = arith.constant 0 : i32
    return %arg0, %c0_i32 : i32, i32
  }
}

module attributes {stable_mosaic.version = 11 : i64} {
  func.func @repeat_explore_kernel(%arg0: i32, %arg1: memref<8x16x32xbf16, #tpu.memory_space<vmem>>, %arg2: memref<8x32xbf16, #tpu.memory_space<vmem>>, %arg3: memref<32x32xbf16, #tpu.memory_space<vmem>>, %arg4: memref<32x32xbf16, #tpu.memory_space<vmem>>, %arg5: memref<1x32xbf16, #tpu.memory_space<vmem>>, %arg6: memref<2x32xbf16, #tpu.memory_space<vmem>>, %arg7: memref<8x128xf32, #tpu.memory_space<vmem>>) attributes {dimension_semantics = [#tpu.dimension_semantics<parallel>], iteration_bounds = array<i64: 1>, scalar_prefetch = 0 : i64, scratch_operands = 0 : i64, tpu.core_type = #tpu.core_type<tc>, window_params = [{transform_indices = @transform_0, window_bounds = array<i64: 8, 16, 32>}, {transform_indices = @transform_1, window_bounds = array<i64: 8, 32>}, {pipeline_mode = #tpu.pipeline_mode<synchronous>, transform_indices = @transform_2, window_bounds = array<i64: 32, 32>}, {pipeline_mode = #tpu.pipeline_mode<synchronous>, transform_indices = @transform_3, window_bounds = array<i64: 32, 32>}, {pipeline_mode = #tpu.pipeline_mode<synchronous>, transform_indices = @transform_4, window_bounds = array<i64: 1, 32>}, {pipeline_mode = #tpu.pipeline_mode<synchronous>, transform_indices = @transform_5, window_bounds = array<i64: 2, 32>}, {transform_indices = @transform_6, window_bounds = array<i64: 8, 128>}]} {
    %c0 = arith.constant 0 : index
    %c0_0 = arith.constant 0 : index
    %0 = vector.load %arg2[%c0, %c0_0] : memref<8x32xbf16, #tpu.memory_space<vmem>>, vector<8x32xbf16>
    %c0_1 = arith.constant 0 : index
    %c0_2 = arith.constant 0 : index
    %1 = vector.load %arg4[%c0_1, %c0_2] : memref<32x32xbf16, #tpu.memory_space<vmem>>, vector<32x32xbf16>
    %cst = arith.constant dense<0.000000e+00> : vector<8x32xf32>
    %2 = tpu.matmul %0, %1, %cst {dimension_numbers = #tpu.dot_dimension_numbers<[1], [0], [0], [1], [0, 0, 1, 1], [], []>} : vector<8x32xbf16>, vector<32x32xbf16>, vector<8x32xf32> -> vector<8x32xf32>
    %3 = vector.shape_cast %2 : vector<8x32xf32> to vector<8x1x32xf32>
    %c0_3 = arith.constant 0 : index
    %c0_4 = arith.constant 0 : index
    %4 = vector.load %arg5[%c0_3, %c0_4] : memref<1x32xbf16, #tpu.memory_space<vmem>>, vector<1x32xbf16>
    %5 = arith.extf %4 : vector<1x32xbf16> to vector<1x32xf32>
    %cst_5 = arith.constant -1.000000e+30 : f32
    %6 = vector.broadcast %cst_5 : f32 to vector<8x1xf32>
    %cst_6 = arith.constant 0.000000e+00 : f32
    %7 = vector.broadcast %cst_6 : f32 to vector<8x1xf32>
    %cst_7 = arith.constant 0.000000e+00 : f32
    %8 = vector.broadcast %cst_7 : f32 to vector<8x32xf32>
    %c0_8 = arith.constant 0 : index
    %c0_9 = arith.constant 0 : index
    %c0_10 = arith.constant 0 : index
    %9 = vector.load %arg1[%c0_8, %c0_9, %c0_10] : memref<8x16x32xbf16, #tpu.memory_space<vmem>>, vector<8x16x32xbf16>
    %10 = vector.shape_cast %9 : vector<8x16x32xbf16> to vector<128x32xbf16>
    %c0_11 = arith.constant 0 : index
    %c0_12 = arith.constant 0 : index
    %11 = vector.load %arg3[%c0_11, %c0_12] : memref<32x32xbf16, #tpu.memory_space<vmem>>, vector<32x32xbf16>
    %cst_13 = arith.constant dense<0.000000e+00> : vector<128x32xf32>
    %12 = tpu.matmul %10, %11, %cst_13 {dimension_numbers = #tpu.dot_dimension_numbers<[1], [0], [0], [1], [0, 0, 1, 1], [], []>} : vector<128x32xbf16>, vector<32x32xbf16>, vector<128x32xf32> -> vector<128x32xf32>
    %13 = vector.shape_cast %12 : vector<128x32xf32> to vector<8x16x32xf32>
    %14 = vector.broadcast %3 : vector<8x1x32xf32> to vector<8x16x32xf32>
    %15 = arith.addf %13, %14 : vector<8x16x32xf32>
    %16 = math.tanh %15 : vector<8x16x32xf32>
    %17 = vector.shape_cast %5 : vector<1x32xf32> to vector<1x1x32xf32>
    %18 = vector.broadcast %17 : vector<1x1x32xf32> to vector<8x16x32xf32>
    %19 = arith.mulf %16, %18 : vector<8x16x32xf32>
    %cst_14 = arith.constant dense<0.000000e+00> : vector<8x16xf32>
    %20 = vector.multi_reduction <add>, %19, %cst_14 [2] : vector<8x16x32xf32> to vector<8x16xf32>
    %21 = tpu.iota {dimensions = array<i32: 1>} : vector<8x16xi32>
    %c0_i32 = arith.constant 0 : i32
    %22 = vector.broadcast %c0_i32 : i32 to vector<8x16xi32>
    %23 = arith.addi %22, %21 : vector<8x16xi32>
    %c8_i32 = arith.constant 8 : i32
    %24 = vector.broadcast %c8_i32 : i32 to vector<8x16xi32>
    %25 = arith.cmpi slt, %23, %24 : vector<8x16xi32>
    %cst_15 = arith.constant -1.000000e+30 : f32
    %26 = vector.broadcast %cst_15 : f32 to vector<8x16xf32>
    %27 = arith.select %25, %20, %26 : vector<8x16xi1>, vector<8x16xf32>
    %cst_16 = arith.constant dense<0xFF800000> : vector<8xf32>
    %28 = vector.multi_reduction <maximumf>, %27, %cst_16 [1] : vector<8x16xf32> to vector<8xf32>
    %29 = vector.shape_cast %28 : vector<8xf32> to vector<8x1xf32>
    %30 = arith.maximumf %6, %29 : vector<8x1xf32>
    %31 = arith.subf %6, %30 : vector<8x1xf32>
    %32 = math.exp %31 : vector<8x1xf32>
    %33 = vector.broadcast %30 : vector<8x1xf32> to vector<8x16xf32>
    %34 = arith.subf %27, %33 : vector<8x16xf32>
    %35 = math.exp %34 : vector<8x16xf32>
    %36 = arith.mulf %32, %7 : vector<8x1xf32>
    %cst_17 = arith.constant dense<0.000000e+00> : vector<8xf32>
    %37 = vector.multi_reduction <add>, %35, %cst_17 [1] : vector<8x16xf32> to vector<8xf32>
    %38 = vector.shape_cast %37 : vector<8xf32> to vector<8x1xf32>
    %39 = arith.addf %36, %38 : vector<8x1xf32>
    %40 = vector.broadcast %32 : vector<8x1xf32> to vector<8x32xf32>
    %41 = arith.mulf %40, %8 : vector<8x32xf32>
    %42 = vector.shape_cast %35 : vector<8x16xf32> to vector<8x16x1xf32>
    %43 = arith.extf %9 : vector<8x16x32xbf16> to vector<8x16x32xf32>
    %44 = vector.broadcast %42 : vector<8x16x1xf32> to vector<8x16x32xf32>
    %45 = arith.mulf %44, %43 : vector<8x16x32xf32>
    %cst_18 = arith.constant dense<0.000000e+00> : vector<8x32xf32>
    %46 = vector.multi_reduction <add>, %45, %cst_18 [1] : vector<8x16x32xf32> to vector<8x32xf32>
    %47 = arith.addf %41, %46 : vector<8x32xf32>
    %48 = vector.broadcast %39 : vector<8x1xf32> to vector<8x32xf32>
    %49 = arith.divf %47, %48 : vector<8x32xf32>
    %c0_19 = arith.constant 0 : index
    %c0_20 = arith.constant 0 : index
    %50 = vector.load %arg6[%c0_19, %c0_20] : memref<2x32xbf16, #tpu.memory_space<vmem>>, vector<2x32xbf16>
    %51 = arith.extf %50 : vector<2x32xbf16> to vector<2x32xf32>
    %52 = vector.extract_strided_slice %51 {offsets = [0, 0], sizes = [1, 32], strides = [1, 1]} : vector<2x32xf32> to vector<1x32xf32>
    %53 = vector.broadcast %52 : vector<1x32xf32> to vector<8x32xf32>
    %54 = arith.mulf %49, %53 : vector<8x32xf32>
    %cst_21 = arith.constant dense<0.000000e+00> : vector<8xf32>
    %55 = vector.multi_reduction <add>, %54, %cst_21 [1] : vector<8x32xf32> to vector<8xf32>
    %56 = vector.shape_cast %55 : vector<8xf32> to vector<8x1xf32>
    %57 = vector.extract_strided_slice %51 {offsets = [1, 0], sizes = [1, 32], strides = [1, 1]} : vector<2x32xf32> to vector<1x32xf32>
    %58 = vector.broadcast %57 : vector<1x32xf32> to vector<8x32xf32>
    %59 = arith.mulf %49, %58 : vector<8x32xf32>
    %cst_22 = arith.constant dense<0.000000e+00> : vector<8xf32>
    %60 = vector.multi_reduction <add>, %59, %cst_22 [1] : vector<8x32xf32> to vector<8xf32>
    %61 = vector.shape_cast %60 : vector<8xf32> to vector<8x1xf32>
    %62 = arith.maximumf %56, %61 : vector<8x1xf32>
    %63 = arith.subf %56, %62 : vector<8x1xf32>
    %64 = math.exp %63 : vector<8x1xf32>
    %65 = arith.subf %61, %62 : vector<8x1xf32>
    %66 = math.exp %65 : vector<8x1xf32>
    %67 = arith.addf %64, %66 : vector<8x1xf32>
    %cst_23 = arith.constant 1.000000e+00 : f32
    %68 = vector.broadcast %cst_23 : f32 to vector<8x1xf32>
    %69 = arith.divf %68, %67 : vector<8x1xf32>
    %70 = tpu.iota {dimensions = array<i32: 1>} : vector<8x128xi32>
    %c0_i32_24 = arith.constant 0 : i32
    %71 = vector.broadcast %c0_i32_24 : i32 to vector<8x128xi32>
    %72 = arith.cmpi eq, %70, %71 : vector<8x128xi32>
    %73 = arith.mulf %64, %69 : vector<8x1xf32>
    %c1_i32 = arith.constant 1 : i32
    %74 = vector.broadcast %c1_i32 : i32 to vector<8x128xi32>
    %75 = arith.cmpi eq, %70, %74 : vector<8x128xi32>
    %76 = arith.mulf %66, %69 : vector<8x1xf32>
    %cst_25 = arith.constant 0.000000e+00 : f32
    %77 = vector.shape_cast %76 : vector<8x1xf32> to vector<8x1xf32>
    %78 = vector.broadcast %77 : vector<8x1xf32> to vector<8x128xf32>
    %79 = vector.broadcast %cst_25 : f32 to vector<8x128xf32>
    %80 = arith.select %75, %78, %79 : vector<8x128xi1>, vector<8x128xf32>
    %81 = vector.shape_cast %73 : vector<8x1xf32> to vector<8x1xf32>
    %82 = vector.broadcast %81 : vector<8x1xf32> to vector<8x128xf32>
    %83 = arith.select %72, %82, %80 : vector<8x128xi1>, vector<8x128xf32>
    %c0_26 = arith.constant 0 : index
    %c0_27 = arith.constant 0 : index
    %84 = vector.load %arg7[%c0_26, %c0_27] : memref<8x128xf32, #tpu.memory_space<vmem>>, vector<8x128xf32>
    tpu.vector_store %arg7[%c0_26, %c0_27], %83 {strides = array<i32>} : memref<8x128xf32, #tpu.memory_space<vmem>>, vector<8x128xf32>,
    return
  }
  func.func @transform_0(%arg0: i32) -> (i32, i32, i32) {
    %c0_i32 = arith.constant 0 : i32
    %c0_i32_0 = arith.constant 0 : i32
    %c0_i32_1 = arith.constant 0 : i32
    return %arg0, %c0_i32, %c0_i32_0 : i32, i32, i32
  }
  func.func @transform_1(%arg0: i32) -> (i32, i32) {
    %c0_i32 = arith.constant 0 : i32
    %c0_i32_0 = arith.constant 0 : i32
    return %arg0, %c0_i32 : i32, i32
  }
  func.func @transform_2(%arg0: i32) -> (i32, i32) {
    %c0_i32 = arith.constant 0 : i32
    %c0_i32_0 = arith.constant 0 : i32
    %c0_i32_1 = arith.constant 0 : i32
    return %c0_i32, %c0_i32_0 : i32, i32
  }
  func.func @transform_3(%arg0: i32) -> (i32, i32) {
    %c0_i32 = arith.constant 0 : i32
    %c0_i32_0 = arith.constant 0 : i32
    %c0_i32_1 = arith.constant 0 : i32
    return %c0_i32, %c0_i32_0 : i32, i32
  }
  func.func @transform_4(%arg0: i32) -> (i32, i32) {
    %c0_i32 = arith.constant 0 : i32
    %c0_i32_0 = arith.constant 0 : i32
    %c0_i32_1 = arith.constant 0 : i32
    return %c0_i32, %c0_i32_0 : i32, i32
  }
  func.func @transform_5(%arg0: i32) -> (i32, i32) {
    %c0_i32 = arith.constant 0 : i32
    %c0_i32_0 = arith.constant 0 : i32
    %c0_i32_1 = arith.constant 0 : i32
    return %c0_i32, %c0_i32_0 : i32, i32
  }
  func.func @transform_6(%arg0: i32) -> (i32, i32) {
    %c0_i32 = arith.constant 0 : i32
    %c0_i32_0 = arith.constant 0 : i32
    return %arg0, %c0_i32 : i32, i32
  }
}

</mosaic_0001>

<bundles_post_ra>
// kernel: tpu_custom_call.1
= control target key start
LH: loop header
LB: loop body
LE: loop exit
PB: predicated region body
PF: predicated region fallthrough
CT: control target
= control target key end

     0   :  { %11 = vsyncpa [#allocation3], 0  ;;  %s1472_s0 = inlined_call_operand.hbm [shape: bf16[8,16,32], index: 0, kind: input, shape index: {}]   ;;  %s1473_s1 = inlined_call_operand.hbm [shape: bf16[8,32], index: 1, kind: input, shape index: {}]   ;;  %s1474_s2 = inlined_call_operand.hbm [shape: bf16[32,32], index: 2, kind: input, shape index: {}]   ;;  %s1475_s3 = inlined_call_operand.hbm [shape: bf16[32,32], index: 3, kind: input, shape index: {}]   ;;  %s1476_s4 = inlined_call_operand.vmem [shape: bf16[1,32], index: 4, kind: input, shape index: {}]   ;;  %s1477_s5 = inlined_call_operand.vmem [shape: bf16[2,32], index: 5, kind: input, shape index: {}]   ;;  %s1478_s6 = inlined_call_operand.hbm [shape: f32[8,128], index: 6, kind: output, shape index: {}]  }
   0x1   :  { %12 = vsyncpa [#allocation6], 0 }
   0x2   :  { %13 = vsyncpa [#allocation9], 0 }
   0x3   :  { %14 = vsyncpa [#allocation4], 0  ;;  %s1170_s21 = smov [#allocation5]   ;;  %s1171_s23 = smov [#allocation2]  }
   0x4   :  { %s33_s22 = sshll.u32 %s1170_s21, 4  ;;  %s20_s24 = sshll.u32 %s1171_s23, 4  ;;  %s34_s22 = int_to_ptr.vmem [resolvable:$true] %s33_s22  ;;  %s1215_s24 = int_to_ptr.vmem [resolvable:$true] %s20_s24 }
   0x5   :  { %s1052_s27 = scalar_lea.hbm %s1473_s1, 64 }
   0x6   :  { %p1053_p0 = scmp.ne.s32.totalorder %s1473_s1, %s1052_s27  ;;  %p1056_p1 = scmp.lt.u32.totalorder %s1052_s27, %s1473_s1 }
   0x8   :  { %p1058_p2 = pnand %p1056_p1, %p1053_p0 }
   0xa   :  { %1061 = shalt.err (!%p1058_p2)
}
   0xb   :  { %s1062_s8 = scalar_lea.vmem %s34_s22, 64  ;;  %p1067_p4 = scmp.lt.s32.totalorder %s34_s22, %s34_s22 }
   0xc   :  { %p1063_p3 = scmp.ne.s32.totalorder %s34_s22, %s1062_s8  ;;  %p1068_p5 = scmp.lt.s32.totalorder %s1062_s8, %s1062_s8 }
   0xe   :  { %p1069_p6 = por %p1068_p5, %p1067_p4 }
  0x10   :  { %p1070_p7 = pnand %p1069_p6, %p1063_p3 }
  0x12   :  { %1073 = shalt.err (!%p1070_p7)
}
  0x13   :  { %36 = dma.hbm_to_vmem [thread:$0]  %s1473_s1, 64, %s34_s22, [#allocation6]  }
  0x14   :  { %s1074_s13 = scalar_lea.hbm %s1472_s0, 1024 }
  0x15   :  { %p1075_p8 = scmp.ne.s32.totalorder %s1472_s0, %s1074_s13  ;;  %p1078_p9 = scmp.lt.u32.totalorder %s1074_s13, %s1472_s0 }
  0x17   :  { %p1080_p10 = pnand %p1078_p9, %p1075_p8 }
  0x19   :  { %1083 = shalt.err (!%p1080_p10)
}
  0x1a   :  { %s1084_s18 = scalar_lea.vmem %s1215_s24, 1024  ;;  %p1089_p12 = scmp.lt.s32.totalorder %s1215_s24, %s1215_s24 }
  0x1b   :  { %p1085_p11 = scmp.ne.s32.totalorder %s1215_s24, %s1084_s18  ;;  %p1090_p13 = scmp.lt.s32.totalorder %s1084_s18, %s1084_s18 }
  0x1d   :  { %p1091_p0 = por %p1090_p13, %p1089_p12 }
  0x1f   :  { %p1092_p1 = pnand %p1091_p0, %p1085_p11 }
  0x21   :  { %1095 = shalt.err (!%p1092_p1)
}
  0x22   :  { %s1172_s1 = smov 64   ;;  %s1173_s19 = smov 4  }
  0x23   :  { %26 = dma.hbm_to_vmem [thread:$0]  %s1472_s0, 1024, %s1215_s24, [#allocation3], %s1172_s1, %s1172_s1, %s1173_s19  }
  0x24   :  { %s1174_s22 = smov [#allocation7]   ;;  %s1175_s25 = smov [#allocation8]  }
  0x25   :  { %s42_s23 = sshll.u32 %s1174_s22, 4  ;;  %s54_s26 = sshll.u32 %s1175_s25, 4  ;;  %s43_s23 = int_to_ptr.vmem [resolvable:$true] %s42_s23  ;;  %s1249_s26 = int_to_ptr.vmem [resolvable:$true] %s54_s26 }
  0x26   :  { %s1096_s29 = scalar_lea.hbm %s1474_s2, 256 }
  0x27   :  { %p1097_p2 = scmp.ne.s32.totalorder %s1474_s2, %s1096_s29  ;;  %p1100_p3 = scmp.lt.u32.totalorder %s1096_s29, %s1474_s2 }
  0x29   :  { %p1102_p4 = pnand %p1100_p3, %p1097_p2 }
  0x2b   :  { %1105 = shalt.err (!%p1102_p4)
}
  0x2c   :  { %s1106_s0 = scalar_lea.vmem %s43_s23, 256  ;;  %p1111_p6 = scmp.lt.s32.totalorder %s43_s23, %s43_s23 }
  0x2d   :  { %p1107_p5 = scmp.ne.s32.totalorder %s43_s23, %s1106_s0  ;;  %p1112_p7 = scmp.lt.s32.totalorder %s1106_s0, %s1106_s0 }
  0x2f   :  { %p1113_p8 = por %p1112_p7, %p1111_p6 }
  0x31   :  { %p1114_p9 = pnand %p1113_p8, %p1107_p5 }
  0x33   :  { %1117 = shalt.err (!%p1114_p9)
}
  0x34   :  { %48 = dma.hbm_to_vmem [thread:$0]  %s1474_s2, 256, %s43_s23, [#allocation6], %s1172_s1, %s1172_s1, %s1173_s19  }
  0x35   :  { %s1118_s13 = scalar_lea.hbm %s1475_s3, 256 }
  0x36   :  { %p1119_p10 = scmp.ne.s32.totalorder %s1475_s3, %s1118_s13  ;;  %p1122_p11 = scmp.lt.u32.totalorder %s1118_s13, %s1475_s3 }
  0x38   :  { %p1124_p12 = pnand %p1122_p11, %p1119_p10 }
  0x3a   :  { %1127 = shalt.err (!%p1124_p12)
}
  0x3b   :  { %s1128_s18 = scalar_lea.vmem %s1249_s26, 256  ;;  %p1133_p0 = scmp.lt.s32.totalorder %s1249_s26, %s1249_s26 }
  0x3c   :  { %p1129_p13 = scmp.ne.s32.totalorder %s1249_s26, %s1128_s18  ;;  %p1134_p1 = scmp.lt.s32.totalorder %s1128_s18, %s1128_s18 }
  0x3e   :  { %p1135_p2 = por %p1134_p1, %p1133_p0 }
  0x40   :  { %p1136_p3 = pnand %p1135_p2, %p1129_p13 }
  0x42   :  { %1139 = shalt.err (!%p1136_p3)
}
  0x43   :  { %60 = dma.hbm_to_vmem [thread:$0]  %s1475_s3, 256, %s1249_s26, [#allocation9], %s1172_s1, %s1172_s1, %s1173_s19  }
  0x44   :  { %1162 = dma.done.wait [#allocation3], 1024  }
  0x45   :  { %1163 = vsyncadd [#allocation3], 4294966272 }
  0x46   :  { %1164 = dma.done.wait [#allocation6], 320  }
  0x47   :  { %1165 = vsyncadd [#allocation6], 4294966976 }
  0x48   :  { %1166 = dma.done.wait [#allocation9], 256  }
  0x49   :  { %1167 = vsyncadd [#allocation9], 4294967040  ;;  %v1176_v0 = vmov 0.0   ;;  %vm1177_vm0 = vmmov 0   ;;  %v988_v1 = vld [vmem:[#allocation8] sm:$0xff]   ;;  %v989_v2 = vld [vmem:[#allocation7] sm:$0xff]   ;;  %v144_v16 = vlaneseq }
  0x4a   :  { %946 = vmatprep.subr.bf16.mxu0 %v1176_v0  ;;  %950 = vmatprep.mubr.msk.bf16.mxu0 %vm1177_vm0, %v1176_v0  ;;  %v990_v3 = vld [vmem:[#allocation8 + $0x8] sm:$0xff]   ;;  %v991_v4 = vld [vmem:[#allocation7 + $0x8] sm:$0xff]   ;;  %vm95_vm1 = vcmask 261120   ;;  %v1178_v14 = vmov 1966171168   ;;  %vm552_vm2 = vcmask 130112  }
  0x4b   :  { %947 = vmatpush3.bf16.msra.mxu0 %v988_v1  ;;  %974 = vmatprep.subr.bf16.mxu1 %v989_v2  ;;  %v1286_v5 = vld [vmem:[#allocation2 + $0x10] sm:$0xff]   ;;  %v1288_v6 = vld [vmem:[#allocation2 + $0x18] sm:$0xff]   ;;  %v1290_v7 = vld [vmem:[#allocation2] sm:$0xff]   ;;  %v142_v15 = vunpack.c.l.s4 %v1178_v14  ;;  %v1320_v18 = vshrl.u32 %v144_v16, 7  ;;  %vm617_vm3 = vcmask 1041409   ;;  %vm619_vm4 = vcmask 1042434  }
  0x4c   :  { %948 = vmatprep.subr.bf16.mxu0 %v1176_v0  ;;  %976 = vmatpush3.bf16.msra.mxu1 %v989_v2  ;;  %v1292_v8 = vld [vmem:[#allocation2 + $0x20] sm:$0xff]   ;;  %v1299_v10 = vld [vmem:[#allocation2 + $0x8] sm:$0xff]   ;;  %v1307_v12 = vld [vmem:[#allocation2 + $0x30] sm:$0xff]   ;;  %vm621_vm5 = vcmask 1043459   ;;  %vm623_vm6 = vcmask 1044484   ;;  %vm625_vm7 = vcmask 1045509  }
  0x4d   :  { %975 = vmatprep.subr.bf16.mxu1 %v991_v4  ;;  %v78_v9 = vld [vmem:[#allocation5] sm:$0xf]  ;;  %962 = vmatprep.mubr.msk.bf16.mxu1 %vm95_vm1, %v1286_v5  ;;  %v1305_v11 = vld [vmem:[#allocation2 + $0x28] sm:$0xff]   ;;  %v1315_v13 = vld [vmem:[#allocation2 + $0x38] sm:$0xff]   ;;  %v143_v17 = vunpack.c.0.s8 %v142_v15  ;;  %v1324_v31 = vsub.s32 0, %v1320_v18  ;;  %vm627_vm8 = vcmask 1046534  }
  0x4e   :  { %v189_v54 = vld [vmem:[%s1476_s4] sm:$0x1]  ;;  %vm629_vm9 = vcmask 1047559   ;;  %vm633_vm11 = vcmask 130048  }
  0x4f   :  { %949 = vmatpush3.bf16.msra.mxu0 %v990_v3  ;;  %v146_v19 = vsub.s32 %v143_v17, %v1320_v18  ;;  %v190_v3 = vunpack.c.l.bf16 %v189_v54 }
  0x50   :  { %954 = vmatprep.subr.bf16.mxu0 %v989_v2  ;;  %977 = vmatpush3.bf16.msra.mxu1 %v991_v4 }
  0x51   :  { %v1337_v15 = vrot.slane %v190_v3, %v1324_v31 }
  0x52   :  { %951 = vmatmul.mubr.msk.bf16.vlgmr.msra.gmra.mrb[0].mxu0 %vm95_vm1, %v78_v9 }
  0x53   :  { %955 = vmatpush3.bf16.msra.mxu0 %v989_v2  ;;  %958 = vmatprep.mubr.msk.bf16.mxu0 %vm95_vm1, %v1290_v7 }
  0x54   :  { %963 = vmatmul.mubr.msk.bf16.vlgmr.msra.gmra.mrb[0].mxu1 %vm95_vm1, %v1288_v6  ;;  %956 = vmatprep.subr.bf16.mxu0 %v991_v4 }
  0x55   :  { %966 = vmatprep.mubr.msk.bf16.mxu1 %vm95_vm1, %v1292_v8 }
  0x57   :  { %957 = vmatpush3.bf16.msra.mxu0 %v991_v4 }
  0x5a   :  { %959 = vmatmul.mubr.msk.bf16.vlgmr.msra.gmra.mrb[4].mxu0 %vm95_vm1, %v1299_v10 }
  0x5c   :  { %967 = vmatmul.mubr.msk.bf16.gmra.mrb[4].mxu1 %vm95_vm1, %v1305_v11 }
  0x5d   :  { %970 = vmatprep.mubr.msk.bf16.mxu1 %vm95_vm1, %v1307_v12 }
  0x64   :  { %971 = vmatmul.mubr.msk.bf16.gmra.mrb[8].mxu1 %vm95_vm1, %v1315_v13 }
 0x125   :  { %v133_v20 = vpop.f32.mrb[0].mxu0 }
 0x126   :  { %v140_v21 = vcombine.high %v133_v20, %v133_v20  ;;  %v147_v22 = vrot.slane %v133_v20, %v146_v19  ;;  %v952_v23 = vpop.f32.mrb[1].mxu0 }
 0x127   :  { %v136_v24 = vpop.f32.mrb[2].mxu0  ;;  %v964_v25 = vpop.f32.mrb[0].mxu1 }
 0x128   :  { %v154_v26 = vrot.slane %v140_v21, %v146_v19  ;;  %v155_v27 = vcombine.high %v147_v22, %v147_v22  ;;  %v163_v28 = vrot.slane %v147_v22, %v146_v19  ;;  %v953_v29 = vpop.f32.mrb[3].mxu0  ;;  %v337_v30 = vpop.f32.mrb[1].mxu1 }
 0x129   :  { %v965_v32 = vpop.f32.mrb[2].mxu1 }
 0x12a   :  { %v156_v33 = vcombine.high %v154_v26, %v154_v26  ;;  %v177_v34 = vrot.slane %v155_v27, %v146_v19  ;;  %v185_v35 = vcombine.high %v163_v28, %v163_v28  ;;  %v340_v36 = vpop.f32.mrb[3].mxu1  ;;  %v170_v37 = vrot.slane %v154_v26, %v146_v19 }
 0x12b   :  { %v387_v43 = vrot.slane %v163_v28, %v1324_v31 }
 0x12c   :  { %v187_v38 = vcombine.high %v177_v34, %v177_v34  ;;  %v395_v39 = vrot.slane %v185_v35, %v1324_v31  ;;  %v391_v40 = vrot.slane %v177_v34, %v1324_v31  ;;  %v184_v41 = vrot.slane %v156_v33, %v146_v19 }
 0x12d   :  { %v960_v42 = vpop.f32.mrb[4].mxu0  ;;  %v403_v53 = vrot.slane %v170_v37, %v1324_v31  ;;  %v186_v9 = vcombine.high %v170_v37, %v170_v37 }
 0x12e   :  { %v399_v44 = vrot.slane %v187_v38, %v1324_v31  ;;  %v428_v45 = vadd.f32 %v395_v39, %v337_v30  ;;  %v426_v46 = vadd.f32 %v960_v42, %v391_v40  ;;  %v429_v47 = vadd.f32 %v395_v39, %v340_v36  ;;  %v321_v48 = vpop.f32.mrb[5].mxu0 }
 0x12f   :  { %v424_v49 = vadd.f32 %v387_v43, %v321_v48  ;;  %v968_v50 = vpop.f32.mrb[4].mxu1  ;;  %v407_v51 = vrot.slane %v184_v41, %v1324_v31  ;;  %v961_v52 = vpop.f32.mrb[6].mxu0  ;;  %v188_v2 = vcombine.high %v184_v41, %v184_v41  ;;  %v411_v19 = vrot.slane %v186_v9, %v1324_v31 }
 0x130   :  { %v430_v55 = vadd.f32 %v964_v25, %v399_v44  ;;  %1008 = vtanh.f32 %v428_v45  ;;  %v431_v56 = vadd.f32 %v965_v32, %v399_v44  ;;  %v427_v57 = vadd.f32 %v961_v52, %v391_v40  ;;  %v353_v58 = vpop.f32.mrb[5].mxu1  ;;  %v324_v59 = vpop.f32.mrb[7].mxu0 }
 0x131   :  { %1010 = vtanh.f32 %v426_v46  ;;  %v434_v60 = vadd.f32 %v968_v50, %v407_v51  ;;  %v432_v61 = vadd.f32 %v403_v53, %v353_v58  ;;  %v425_v62 = vadd.f32 %v387_v43, %v324_v59  ;;  %v969_v63 = vpop.f32.mrb[6].mxu1 }
 0x132   :  { %v435_v0 = vadd.f32 %v969_v63, %v407_v51  ;;  %v356_v1 = vpop.f32.mrb[7].mxu1  ;;  %1012 = vtanh.f32 %v430_v55  ;;  %v415_v14 = vrot.slane %v188_v2, %v1324_v31 }
 0x133   :  { %v433_v4 = vadd.f32 %v403_v53, %v356_v1  ;;  %1014 = vtanh.f32 %v429_v47 }
 0x134   :  { %1016 = vtanh.f32 %v424_v49 }
 0x135   :  { %1018 = vtanh.f32 %v427_v57 }
 0x136   :  { %1020 = vtanh.f32 %v431_v56 }
 0x137   :  { %v972_v17 = vpop.f32.mrb[8].mxu1  ;;  %1022 = vtanh.f32 %v432_v61 }
 0x138   :  { %v438_v20 = vadd.f32 %v972_v17, %v415_v14  ;;  %v369_v21 = vpop.f32.mrb[9].mxu1  ;;  %1024 = vtanh.f32 %v434_v60 }
 0x139   :  { %v436_v22 = vadd.f32 %v411_v19, %v369_v21  ;;  %v973_v23 = vpop.f32.mrb[10].mxu1  ;;  %1026 = vtanh.f32 %v435_v0 }
 0x13a   :  { %v1009_v24 = vpop.eup %1008  ;;  %v439_v25 = vadd.f32 %v973_v23, %v415_v14  ;;  %v372_v26 = vpop.f32.mrb[11].mxu1  ;;  %1028 = vtanh.f32 %v425_v62 }
 0x13b   :  { %v1011_v27 = vpop.eup %1010  ;;  %v437_v28 = vadd.f32 %v411_v19, %v372_v26  ;;  %v464_v29 = vmul.f32 %v1009_v24, %v1337_v15  ;;  %1030 = vtanh.f32 %v433_v4 }
 0x13c   :  { %v462_v30 = vmul.f32 %v1011_v27, %v1337_v15  ;;  %v1013_v32 = vpop.eup %1012  ;;  %1032 = vtanh.f32 %v436_v22 }
 0x13d   :  { %v488_v33 = vsel %vm95_vm1, %v464_v29, 0.0  ;;  %v1015_v34 = vpop.eup %1014  ;;  %v466_v43 = vmul.f32 %v1013_v32, %v1337_v15  ;;  %1034 = vtanh.f32 %v437_v28  ;;  %v1373_v29 = vand.u32 127, %v144_v16 }
 0x13e   :  { %489 = vadd.xlane.f32.xlu0 %v488_v33  ;;  %v482_v35 = vsel %vm95_vm1, %v462_v30, 0.0  ;;  %v1017_v36 = vpop.eup %1016  ;;  %v465_v37 = vmul.f32 %v1015_v34, %v1337_v15  ;;  %1036 = vtanh.f32 %v438_v20 }
 0x13f   :  { %483 = vadd.xlane.f32.xlu1 %v482_v35  ;;  %v460_v38 = vmul.f32 %v1017_v36, %v1337_v15  ;;  %v1019_v39 = vpop.eup %1018  ;;  %v494_v47 = vsel %vm95_vm1, %v466_v43, 0.0  ;;  %1038 = vtanh.f32 %v439_v25  ;;  %v547_v30 = vadd.s32 4294967288, %v1373_v29 }
 0x140   :  { %v1021_v40 = vpop.eup %1020  ;;  %v491_v41 = vsel %vm95_vm1, %v465_v37, 0.0  ;;  %v463_v44 = vmul.f32 %v1019_v39, %v1337_v15  ;;  %v545_v36 = vsub.s32 %v1373_v29, %v1320_v18  ;;  %vm526_vm10 = vcmp.lt.s32.totalorder %v1373_v29, 8 }
 0x141   :  { %v476_v42 = vsel %vm95_vm1, %v460_v38, 0.0  ;;  %v1023_v45 = vpop.eup %1022  ;;  %v467_v50 = vmul.f32 %v1021_v40, %v1337_v15  ;;  %v550_v33 = vsub.s32 %v547_v30, %v1320_v18  ;;  %v673_v30 = vsub.s32 2, %v1320_v18 }
 0x142   :  { %477 = vadd.xlane.f32.xlu0 %v476_v42  ;;  %v1025_v46 = vpop.eup %1024  ;;  %v485_v48 = vsel %vm95_vm1, %v463_v44, 0.0  ;;  %v468_v49 = vmul.f32 %v1023_v45, %v1337_v15  ;;  %vm890_vm12 = vcmp.eq.s32.totalorder %v1373_v29, 1  ;;  %vm888_vm13 = vcmp.eq.s32.totalorder %v1373_v29, 0 }
 0x143   :  { %492 = vadd.xlane.f32.xlu1 %v491_v41  ;;  %v1027_v51 = vpop.eup %1026  ;;  %v497_v54 = vsel %vm95_vm1, %v467_v50, 0.0  ;;  %v470_v55 = vmul.f32 %v1025_v46, %v1337_v15 }
 0x144   :  { %v1029_v52 = vpop.eup %1028  ;;  %v500_v53 = vsel %vm95_vm1, %v468_v49, 0.0  ;;  %v471_v56 = vmul.f32 %v1027_v51, %v1337_v15 }
 0x145   :  { %v1031_v57 = vpop.eup %1030  ;;  %v506_v59 = vsel %vm95_vm1, %v470_v55, 0.0  ;;  %v461_v62 = vmul.f32 %v1029_v52, %v1337_v15 }
 0x146   :  { %495 = vadd.xlane.f32.xlu0 %v494_v47  ;;  %v1033_v58 = vpop.eup %1032  ;;  %v509_v60 = vsel %vm95_vm1, %v471_v56, 0.0  ;;  %v469_v61 = vmul.f32 %v1031_v57, %v1337_v15 }
 0x147   :  { %486 = vadd.xlane.f32.xlu1 %v485_v48  ;;  %v1035_v63 = vpop.eup %1034  ;;  %v479_v2 = vsel %vm95_vm1, %v461_v62, 0.0  ;;  %v472_v4 = vmul.f32 %v1033_v58, %v1337_v15 }
 0x148   :  { %v1037_v0 = vpop.eup %1036  ;;  %v503_v1 = vsel %vm95_vm1, %v469_v61, 0.0  ;;  %v473_v3 = vmul.f32 %v1035_v63, %v1337_v15 }
 0x149   :  { %v1039_v9 = vpop.eup %1038  ;;  %v512_v17 = vsel %vm95_vm1, %v472_v4, 0.0  ;;  %v474_v20 = vmul.f32 %v1037_v0, %v1337_v15 }
 0x14a   :  { %501 = vadd.xlane.f32.xlu0 %v500_v53  ;;  %v515_v14 = vsel %vm95_vm1, %v473_v3, 0.0  ;;  %v475_v19 = vmul.f32 %v1039_v9, %v1337_v15 }
 0x14b   :  { %498 = vadd.xlane.f32.xlu1 %v497_v54  ;;  %v518_v22 = vsel %vm95_vm1, %v474_v20, 0.0 }
 0x14c   :  { %v521_v21 = vsel %vm95_vm1, %v475_v19, 0.0 }
 0x14e   :  { %507 = vadd.xlane.f32.xlu0 %v506_v59 }
 0x14f   :  { %510 = vadd.xlane.f32.xlu1 %v509_v60 }
 0x152   :  { %480 = vadd.xlane.f32.xlu0 %v479_v2 }
 0x153   :  { %504 = vadd.xlane.f32.xlu1 %v503_v1 }
 0x156   :  { %513 = vadd.xlane.f32.xlu0 %v512_v17 }
 0x157   :  { %516 = vadd.xlane.f32.xlu1 %v515_v14 }
 0x15a   :  { %519 = vadd.xlane.f32.xlu0 %v518_v22 }
 0x15b   :  { %522 = vadd.xlane.f32.xlu1 %v521_v21 }
 0x1cb   :  { %v490_v23 = vpop.xlane.xlu0 %489 }
 0x1cc   :  { %v484_v24 = vpop.xlane.xlu1 %483  ;;  %v566_v44 = vrot.slane %v490_v23, %v545_v36 }
 0x1cd   :  { %v557_v16 = vrot.slane %v484_v24, %v545_v36 }
 0x1cf   :  { %v478_v26 = vpop.xlane.xlu0 %477 }
 0x1d0   :  { %v493_v25 = vpop.xlane.xlu1 %492  ;;  %v546_v41 = vrot.slane %v478_v26, %v545_v36 }
 0x1d1   :  { %v570_v38 = vrot.slane %v493_v25, %v550_v33 }
 0x1d3   :  { %v496_v27 = vpop.xlane.xlu0 %495  ;;  %v571_v51 = vsel %vm552_vm2, %v570_v38, %v566_v44  ;;  %v717_v38 = vsub.s32 6, %v1320_v18 }
 0x1d4   :  { %v487_v28 = vpop.xlane.xlu1 %486  ;;  %v575_v45 = vrot.slane %v496_v27, %v545_v36 }
 0x1d5   :  { %v561_v37 = vrot.slane %v487_v28, %v550_v33 }
 0x1d7   :  { %v502_v15 = vpop.xlane.xlu0 %501  ;;  %v562_v47 = vsel %vm552_vm2, %v561_v37, %v557_v16 }
 0x1d8   :  { %v499_v32 = vpop.xlane.xlu1 %498  ;;  %v584_v52 = vrot.slane %v502_v15, %v545_v36 }
 0x1d9   :  { %v579_v42 = vrot.slane %v499_v32, %v550_v33  ;;  %v684_v32 = vsub.s32 3, %v1320_v18 }
 0x1db   :  { %v508_v34 = vpop.xlane.xlu0 %507  ;;  %v580_v56 = vsel %vm552_vm2, %v579_v42, %v575_v45 }
 0x1dc   :  { %v511_v35 = vpop.xlane.xlu1 %510  ;;  %v593_v48 = vrot.slane %v508_v34, %v545_v36  ;;  %v695_v34 = vsub.s32 4, %v1320_v18 }
 0x1dd   :  { %v597_v49 = vrot.slane %v511_v35, %v550_v33 }
 0x1df   :  { %v481_v40 = vpop.xlane.xlu0 %480  ;;  %v598_v62 = vsel %vm552_vm2, %v597_v49, %v593_v48  ;;  %v740_v49 = vunpack.c.h.bf16 %v1299_v10 }
 0x1e0   :  { %v505_v39 = vpop.xlane.xlu1 %504  ;;  %v551_v43 = vrot.slane %v481_v40, %v550_v33 }
 0x1e1   :  { %v588_v46 = vrot.slane %v505_v39, %v550_v33  ;;  %v662_v39 = vsub.s32 1, %v1320_v18 }
 0x1e2   :  { %v553_v50 = vsel %vm552_vm2, %v551_v43, %v546_v41  ;;  %v728_v41 = vsub.s32 7, %v1320_v18 }
 0x1e3   :  { %v618_v53 = vsel %vm617_vm3, %v562_v47, %v553_v50  ;;  %v514_v55 = vpop.xlane.xlu0 %513  ;;  %v589_v60 = vsel %vm552_vm2, %v588_v46, %v584_v52  ;;  %v738_v50 = vunpack.c.h.bf16 %v1290_v7  ;;  %v741_v52 = vunpack.c.l.bf16 %v1286_v5 }
 0x1e4   :  { %v517_v54 = vpop.xlane.xlu1 %516  ;;  %v620_v57 = vsel %vm619_vm4, %v571_v51, %v618_v53  ;;  %v602_v59 = vrot.slane %v514_v55, %v545_v36  ;;  %v739_v51 = vunpack.c.l.bf16 %v1299_v10  ;;  %v744_v10 = vunpack.c.h.bf16 %v1288_v6 }
 0x1e5   :  { %v606_v58 = vrot.slane %v517_v54, %v550_v33  ;;  %v622_v61 = vsel %vm621_vm5, %v580_v56, %v620_v57  ;;  %v737_v54 = vunpack.c.l.bf16 %v1290_v7  ;;  %v742_v56 = vunpack.c.h.bf16 %v1286_v5 }
 0x1e6   :  { %v624_v63 = vsel %vm623_vm6, %v589_v60, %v622_v61 }
 0x1e7   :  { %v607_v0 = vsel %vm552_vm2, %v606_v58, %v602_v59  ;;  %v520_v2 = vpop.xlane.xlu0 %519  ;;  %v626_v3 = vsel %vm625_vm7, %v598_v62, %v624_v63  ;;  %v743_v58 = vunpack.c.l.bf16 %v1288_v6  ;;  %v746_v6 = vunpack.c.h.bf16 %v1292_v8 }
 0x1e8   :  { %v523_v1 = vpop.xlane.xlu1 %522  ;;  %v611_v9 = vrot.slane %v520_v2, %v545_v36  ;;  %v628_v17 = vsel %vm627_vm8, %v607_v0, %v626_v3  ;;  %v706_v36 = vsub.s32 5, %v1320_v18  ;;  %v745_v3 = vunpack.c.l.bf16 %v1292_v8 }
 0x1e9   :  { %v615_v4 = vrot.slane %v523_v1, %v550_v33 }
 0x1eb   :  { %v616_v14 = vsel %vm552_vm2, %v615_v4, %v611_v9 }
 0x1ec   :  { %v630_v19 = vsel %vm629_vm9, %v616_v14, %v628_v17 }
 0x1ed   :  { %v632_v20 = vsel %vm526_vm10, %v630_v19, -1e+30 }
 0x1ee   :  { %v634_v21 = vsel %vm633_vm11, %v632_v20, -inf }
 0x1ef   :  { %635 = vmax.xlane.f32.xlu0 %v634_v21 }
 0x27c   :  { %v1395_v22 = vpop.xlane.xlu0 %635 }
 0x27d   :  { %v637_v23 = vmax.f32 %v1395_v22, -1e+30 }
 0x27f   :  { %v641_v24 = vsub.f32 %v632_v20, %v637_v23  ;;  %v638_v2 = vsub.f32 -1e+30, %v637_v23 }
 0x281   :  { %v642_v25 = vmul.f32 1.442695, %v641_v24  ;;  %v639_v23 = vmul.f32 1.442695, %v638_v2 }
 0x283   :  { %1040 = vpow2.f32 %v642_v25 }
 0x284   :  { %1042 = vpow2.f32 %v639_v23 }
 0x28d   :  { %v1041_v26 = vpop.eup %1040 }
 0x28e   :  { %v645_v27 = vsel %vm633_vm11, %v1041_v26, 0.0  ;;  %v652_v28 = vrot.slane %v1041_v26, %v1324_v31  ;;  %v674_v15 = vrot.slane %v1041_v26, %v673_v30  ;;  %v685_v33 = vrot.slane %v1041_v26, %v684_v32 }
 0x28f   :  { %646 = vadd.xlane.f32.xlu1 %v645_v27  ;;  %v696_v35 = vrot.slane %v1041_v26, %v695_v34  ;;  %v707_v37 = vrot.slane %v1041_v26, %v706_v36  ;;  %v718_v40 = vrot.slane %v1041_v26, %v717_v38  ;;  %v663_v16 = vrot.slane %v1041_v26, %v662_v39 }
 0x290   :  { %654 = vbcast.lane.b32.xlu0 %v652_v28, 256  ;;  %v729_v42 = vrot.slane %v1041_v26, %v728_v41  ;;  %v748_v36 = vunpack.c.h.bf16 %v1305_v11  ;;  %v749_v41 = vunpack.c.l.bf16 %v1307_v12 }
 0x294   :  { %676 = vbcast.lane.b32.xlu0 %v674_v15, 256 }
 0x298   :  { %687 = vbcast.lane.b32.xlu0 %v685_v33, 256 }
 0x29c   :  { %698 = vbcast.lane.b32.xlu0 %v696_v35, 256 }
 0x2a0   :  { %709 = vbcast.lane.b32.xlu0 %v707_v37, 256  ;;  %658 = vbcast.lane.b32.xlu1 %v652_v28, 264  ;;  %v747_v28 = vunpack.c.l.bf16 %v1305_v11 }
 0x2a4   :  { %720 = vbcast.lane.b32.xlu0 %v718_v40, 256  ;;  %665 = vbcast.lane.b32.xlu1 %v663_v16, 256 }
 0x2a8   :  { %731 = vbcast.lane.b32.xlu0 %v729_v42, 256  ;;  %669 = vbcast.lane.b32.xlu1 %v663_v16, 264 }
 0x2ac   :  { %680 = vbcast.lane.b32.xlu1 %v674_v15, 264 }
 0x2b0   :  { %691 = vbcast.lane.b32.xlu1 %v685_v33, 264 }
 0x2b4   :  { %702 = vbcast.lane.b32.xlu1 %v696_v35, 264 }
 0x2b8   :  { %713 = vbcast.lane.b32.xlu1 %v707_v37, 264 }
 0x2bc   :  { %724 = vbcast.lane.b32.xlu1 %v718_v40, 264 }
 0x2c0   :  { %735 = vbcast.lane.b32.xlu1 %v729_v42, 264 }
 0x302   :  { %v655_v43 = vpop.permute.xlu0 %654 }
 0x303   :  { %v753_v63 = vmul.f32 %v737_v54, %v655_v43  ;;  %v751_v54 = vunpack.c.l.bf16 %v1315_v13 }
 0x305   :  { %v769_v21 = vsel %vm95_vm1, %v753_v63, 0.0  ;;  %v752_v63 = vunpack.c.h.bf16 %v1315_v13 }
 0x306   :  { %v677_v45 = vpop.permute.xlu0 %676 }
 0x307   :  { %v757_v61 = vmul.f32 %v741_v52, %v677_v45 }
 0x309   :  { %v787_v14 = vsel %vm95_vm1, %v757_v61, 0.0 }
 0x30a   :  { %v688_v47 = vpop.permute.xlu0 %687 }
 0x30b   :  { %v759_v7 = vmul.f32 %v743_v58, %v688_v47 }
 0x30d   :  { %v796_v26 = vsel %vm95_vm1, %v759_v7, 0.0 }
 0x30e   :  { %v699_v57 = vpop.permute.xlu0 %698 }
 0x30f   :  { %v761_v27 = vmul.f32 %v745_v3, %v699_v57 }
 0x311   :  { %v805_v40 = vsel %vm95_vm1, %v761_v27, 0.0 }
 0x312   :  { %v710_v17 = vpop.permute.xlu0 %709 }
 0x313   :  { %v763_v16 = vmul.f32 %v747_v28, %v710_v17 }
 0x315   :  { %v814_v52 = vsel %vm95_vm1, %v763_v16, 0.0 }
 0x316   :  { %v721_v37 = vpop.permute.xlu0 %720 }
 0x31c   :  { %v1408_v44 = vpop.xlane.xlu1 %646 }
 0x320   :  { %v659_v46 = vpop.permute.xlu1 %658 }
 0x321   :  { %v754_v59 = vmul.f32 %v738_v50, %v659_v46 }
 0x323   :  { %v770_v4 = vsel %vm95_vm1, %v754_v59, 0.0 }
 0x324   :  { %v666_v48 = vpop.permute.xlu1 %665  ;;  %v771_v25 = vadd.f32 %v770_v4, %v769_v21  ;;  %v1043_v4 = vpop.eup %1042 }
 0x325   :  { %v755_v60 = vmul.f32 %v739_v51, %v666_v48  ;;  %v644_v23 = vmul.f32 0.0, %v1043_v4 }
 0x326   :  { %v772_v38 = vrot.slane %v771_v25, 4 }
 0x327   :  { %v778_v5 = vsel %vm95_vm1, %v755_v60, 0.0 }
 0x328   :  { %v670_v53 = vpop.permute.xlu1 %669  ;;  %v773_v50 = vadd.f32 %v772_v38, %v771_v25 }
 0x329   :  { %v756_v55 = vmul.f32 %v740_v49, %v670_v53  ;;  %v750_v49 = vunpack.c.h.bf16 %v1307_v12  ;;  %v765_v53 = vmul.f32 %v749_v41, %v721_v37 }
 0x32a   :  { %v774_v12 = vrot.slane %v773_v50, 2 }
 0x32b   :  { %v779_v0 = vsel %vm95_vm1, %v756_v55, 0.0 }
 0x32c   :  { %v681_v62 = vpop.permute.xlu1 %680  ;;  %v780_v19 = vadd.f32 %v779_v0, %v778_v5  ;;  %v775_v21 = vadd.f32 %v774_v12, %v773_v50 }
 0x32d   :  { %v758_v1 = vmul.f32 %v742_v56, %v681_v62  ;;  %v732_v56 = vpop.permute.xlu0 %731 }
 0x32e   :  { %v781_v15 = vrot.slane %v780_v19, 4  ;;  %v767_v2 = vmul.f32 %v751_v54, %v732_v56 }
 0x32f   :  { %v788_v9 = vsel %vm95_vm1, %v758_v1, 0.0 }
 0x330   :  { %v692_v20 = vpop.permute.xlu1 %691  ;;  %v789_v22 = vadd.f32 %v788_v9, %v787_v14  ;;  %v782_v43 = vadd.f32 %v781_v15, %v780_v19 }
 0x331   :  { %v760_v24 = vmul.f32 %v744_v10, %v692_v20  ;;  %v823_v10 = vsel %vm95_vm1, %v765_v53, 0.0 }
 0x332   :  { %v790_v34 = vrot.slane %v789_v22, 4  ;;  %v783_v57 = vrot.slane %v782_v43, 2 }
 0x333   :  { %v797_v30 = vsel %vm95_vm1, %v760_v24, 0.0 }
 0x334   :  { %v798_v32 = vadd.f32 %v797_v30, %v796_v26  ;;  %v703_v33 = vpop.permute.xlu1 %702  ;;  %v791_v47 = vadd.f32 %v790_v34, %v789_v22  ;;  %v784_v5 = vadd.f32 %v783_v57, %v782_v43  ;;  %v776_v34 = vrot.slane %v775_v21, 1 }
 0x335   :  { %v762_v35 = vmul.f32 %v746_v6, %v703_v33  ;;  %v832_v6 = vsel %vm95_vm1, %v767_v2, 0.0 }
 0x336   :  { %v799_v8 = vrot.slane %v798_v32, 4  ;;  %v792_v61 = vrot.slane %v791_v47, 2  ;;  %v785_v27 = vrot.slane %v784_v5, 1  ;;  %v777_v43 = vadd.f32 %v776_v34, %v775_v21 }
 0x337   :  { %v806_v42 = vsel %vm95_vm1, %v762_v35, 0.0 }
 0x338   :  { %v807_v45 = vadd.f32 %v806_v42, %v805_v40  ;;  %v714_v46 = vpop.permute.xlu1 %713  ;;  %v800_v11 = vadd.f32 %v799_v8, %v798_v32  ;;  %v793_v19 = vadd.f32 %v792_v61, %v791_v47  ;;  %v648_v32 = vadd.f32 %v1408_v44, %v644_v23 }
 0x339   :  { %v764_v48 = vmul.f32 %v748_v36, %v714_v46  ;;  %v786_v8 = vadd.f32 %v785_v27, %v784_v5 }
 0x33a   :  { %v808_v51 = vrot.slane %v807_v45, 4  ;;  %v801_v0 = vrot.slane %v800_v11, 2  ;;  %v794_v33 = vrot.slane %v793_v19, 1  ;;  %1044 = vrcp.f32 %v648_v32 }
 0x33b   :  { %v815_v55 = vsel %vm95_vm1, %v764_v48, 0.0 }
 0x33c   :  { %v809_v58 = vadd.f32 %v808_v51, %v807_v45  ;;  %v816_v59 = vadd.f32 %v815_v55, %v814_v52  ;;  %v725_v60 = vpop.permute.xlu1 %724  ;;  %v802_v22 = vadd.f32 %v801_v0, %v800_v11  ;;  %v795_v42 = vadd.f32 %v794_v33, %v793_v19  ;;  %v860_v11 = vld [vmem:[%s1477_s5] sm:$0x1]  ;;  %s1179_s5 = smov [#allocation10]  }
 0x33d   :  { %v766_v62 = vmul.f32 %v750_v49, %v725_v60  ;;  %v849_v49 = vsel %vm617_vm3, %v786_v8, %v777_v43  ;;  %v861_v56 = vunpack.c.l.bf16 %v860_v11  ;;  %s901_s21 = sshll.u32 %s1179_s5, 4  ;;  %s902_s21 = int_to_ptr.vmem [resolvable:$true] %s901_s21 }
 0x33e   :  { %v817_v1 = vrot.slane %v816_v59, 4  ;;  %v810_v3 = vrot.slane %v809_v58, 2  ;;  %v803_v35 = vrot.slane %v802_v22, 1  ;;  %v850_v51 = vsel %vm619_vm4, %v795_v42, %v849_v49  ;;  %s1140_s22 = scalar_lea.vmem %s902_s21, 128  ;;  %p1145_p5 = scmp.lt.s32.totalorder %s902_s21, %s902_s21 }
 0x33f   :  { %v824_v7 = vsel %vm95_vm1, %v766_v62, 0.0  ;;  %v865_v12 = vrot.slane %v861_v56, %v1324_v31  ;;  %p1141_p4 = scmp.ne.s32.totalorder %s902_s21, %s1140_s22  ;;  %p1146_p6 = scmp.lt.s32.totalorder %s1140_s22, %s1140_s22 }
 0x340   :  { %v818_v9 = vadd.f32 %v817_v1, %v816_v59  ;;  %v825_v14 = vadd.f32 %v824_v7, %v823_v10  ;;  %v736_v17 = vpop.permute.xlu1 %735  ;;  %v811_v25 = vadd.f32 %v810_v3, %v809_v58  ;;  %v804_v45 = vadd.f32 %v803_v35, %v802_v22 }
 0x341   :  { %v768_v20 = vmul.f32 %v752_v63, %v736_v17  ;;  %v873_v63 = vrot.slane %v861_v56, %v662_v39  ;;  %p1147_p7 = por %p1146_p6, %p1145_p5 }
 0x342   :  { %v819_v24 = vrot.slane %v818_v9, 2  ;;  %v826_v13 = vrot.slane %v825_v14, 4  ;;  %v812_v38 = vrot.slane %v811_v25, 1  ;;  %v851_v53 = vsel %vm621_vm5, %v804_v45, %v850_v51 }
 0x343   :  { %v833_v26 = vsel %vm95_vm1, %v768_v20, 0.0  ;;  %p1148_p8 = pnand %p1147_p7, %p1141_p4 }
 0x344   :  { %v820_v28 = vadd.f32 %v819_v24, %v818_v9  ;;  %v827_v30 = vadd.f32 %v826_v13, %v825_v14  ;;  %v834_v15 = vadd.f32 %v833_v26, %v832_v6  ;;  %v813_v48 = vadd.f32 %v812_v38, %v811_v25  ;;  %v1045_v61 = vpop.eup %1044 }
 0x346   :  { %v828_v36 = vrot.slane %v827_v30, 2  ;;  %v835_v37 = vrot.slane %v834_v15, 4  ;;  %v821_v40 = vrot.slane %v820_v28, 1  ;;  %v852_v55 = vsel %vm623_vm6, %v813_v48, %v851_v53 }
 0x348   :  { %v829_v16 = vadd.f32 %v828_v36, %v827_v30  ;;  %v836_v41 = vadd.f32 %v835_v37, %v834_v15  ;;  %v822_v44 = vadd.f32 %v821_v40, %v820_v28 }
 0x34a   :  { %v830_v46 = vrot.slane %v829_v16, 1  ;;  %v837_v47 = vrot.slane %v836_v41, 2  ;;  %v853_v58 = vsel %vm625_vm7, %v822_v44, %v852_v55 }
 0x34c   :  { %v838_v50 = vadd.f32 %v837_v47, %v836_v41  ;;  %v831_v52 = vadd.f32 %v830_v46, %v829_v16 }
 0x34e   :  { %v839_v54 = vrot.slane %v838_v50, 1  ;;  %v854_v59 = vsel %vm627_vm8, %v831_v52, %v853_v58 }
 0x350   :  { %v840_v57 = vadd.f32 %v839_v54, %v838_v50 }
 0x352   :  { %v855_v60 = vsel %vm629_vm9, %v840_v57, %v854_v59 }
 0x353   :  { %v857_v62 = vadd.f32 %v855_v60, %v644_v23 }
 0x355   :  { %v859_v0 = vmul.f32 %v1045_v61, %v857_v62 }
 0x357   :  { %v874_v1 = vmul.f32 %v873_v63, %v859_v0  ;;  %v866_v10 = vmul.f32 %v865_v12, %v859_v0 }
 0x359   :  { %v875_v2 = vsel %vm95_vm1, %v874_v1, 0.0  ;;  %v867_v3 = vsel %vm95_vm1, %v866_v10, 0.0 }
 0x35a   :  { %876 = vadd.xlane.f32.xlu1 %v875_v2  ;;  %868 = vadd.xlane.f32.xlu0 %v867_v3 }
 0x3e7   :  { %v877_v7 = vpop.xlane.xlu1 %876  ;;  %v869_v4 = vpop.xlane.xlu0 %868 }
 0x3e8   :  { %v878_v5 = vmax.f32 %v869_v4, %v877_v7 }
 0x3ea   :  { %v879_v9 = vsub.f32 %v869_v4, %v878_v5  ;;  %v882_v14 = vsub.f32 %v877_v7, %v878_v5 }
 0x3ec   :  { %v880_v17 = vmul.f32 1.442695, %v879_v9  ;;  %v883_v19 = vmul.f32 1.442695, %v882_v14 }
 0x3ee   :  { %1046 = vpow2.f32 %v880_v17 }
 0x3ef   :  { %1048 = vpow2.f32 %v883_v19 }
 0x3f8   :  { %v1047_v18 = vpop.eup %1046 }
 0x3f9   :  { %v1049_v31 = vpop.eup %1048 }
 0x3fa   :  { %v885_v39 = vadd.f32 %v1049_v31, %v1047_v18 }
 0x3fc   :  { %1050 = vrcp.f32 %v885_v39 }
 0x406   :  { %v1051_v20 = vpop.eup %1050 }
 0x407   :  { %v889_v21 = vmul.f32 %v1051_v20, %v1047_v18  ;;  %v891_v22 = vmul.f32 %v1051_v20, %v1049_v31 }
 0x409   :  { %v892_v24 = vsel %vm890_vm12, %v891_v22, 0.0 }
 0x40a   :  { %v893_v13 = vsel %vm888_vm13, %v889_v21, %v892_v24 }
 0x40b   :  { %894 = vst [vmem:[#allocation10] sm:$0xff] %v893_v13 }
 0x40c   :  { %1151 = shalt.err (!%p1148_p8)
}
 0x40d   :  { %s1152_s26 = scalar_lea.hbm %s1478_s6, 128 }
 0x40e   :  { %p1153_p9 = scmp.ne.s32.totalorder %s1478_s6, %s1152_s26  ;;  %p1156_p10 = scmp.lt.u32.totalorder %s1152_s26, %s1478_s6 }
 0x410   :  { %p1158_p11 = pnand %p1156_p10, %p1153_p9 }
 0x412   :  { %1161 = shalt.err (!%p1158_p11)
}
 0x413   :  { %904 = dma.vmem_to_hbm [thread:$0]  %s902_s21, 128, %s1478_s6, [#allocation4]  }
 0x414   :  { %1168 = dma.done.wait [#allocation4], 128  }
 0x415   :  { %1169 = vsyncadd [#allocation4], 4294967168 }
 0x416   :  { %908 = vsyncpa [#allocation3], 1 }
 0x417   :  { %909 = vsyncpa [#allocation6], 1 }
 0x418   :  { %910 = vsyncpa [#allocation9], 1 }
 0x419   :  { %911 = vsyncpa [#allocation4], 1 }

// kernel: tpu_custom_call.1
= control target key start
LH: loop header
LB: loop body
LE: loop exit
PB: predicated region body
PF: predicated region fallthrough
CT: control target
= control target key end

     0   :  { %11 = vsyncpa [#allocation3], 0  ;;  %s1472_s0 = inlined_call_operand.hbm [shape: bf16[8,16,32], index: 0, kind: input, shape index: {}]   ;;  %s1473_s1 = inlined_call_operand.hbm [shape: bf16[8,32], index: 1, kind: input, shape index: {}]   ;;  %s1474_s2 = inlined_call_operand.hbm [shape: bf16[32,32], index: 2, kind: input, shape index: {}]   ;;  %s1475_s3 = inlined_call_operand.hbm [shape: bf16[32,32], index: 3, kind: input, shape index: {}]   ;;  %s1476_s4 = inlined_call_operand.vmem [shape: bf16[1,32], index: 4, kind: input, shape index: {}]   ;;  %s1477_s5 = inlined_call_operand.vmem [shape: bf16[2,32], index: 5, kind: input, shape index: {}]   ;;  %s1478_s6 = inlined_call_operand.hbm [shape: f32[8,128], index: 6, kind: output, shape index: {}]  }
   0x1   :  { %12 = vsyncpa [#allocation6], 0 }
   0x2   :  { %13 = vsyncpa [#allocation9], 0 }
   0x3   :  { %14 = vsyncpa [#allocation4], 0  ;;  %s1170_s21 = smov [#allocation5]   ;;  %s1171_s23 = smov [#allocation2]  }
   0x4   :  { %s33_s22 = sshll.u32 %s1170_s21, 4  ;;  %s20_s24 = sshll.u32 %s1171_s23, 4  ;;  %s34_s22 = int_to_ptr.vmem [resolvable:$true] %s33_s22  ;;  %s1215_s24 = int_to_ptr.vmem [resolvable:$true] %s20_s24 }
   0x5   :  { %s1052_s27 = scalar_lea.hbm %s1473_s1, 64 }
   0x6   :  { %p1053_p0 = scmp.ne.s32.totalorder %s1473_s1, %s1052_s27  ;;  %p1056_p1 = scmp.lt.u32.totalorder %s1052_s27, %s1473_s1 }
   0x8   :  { %p1058_p2 = pnand %p1056_p1, %p1053_p0 }
   0xa   :  { %1061 = shalt.err (!%p1058_p2)
}
   0xb   :  { %s1062_s8 = scalar_lea.vmem %s34_s22, 64  ;;  %p1067_p4 = scmp.lt.s32.totalorder %s34_s22, %s34_s22 }
   0xc   :  { %p1063_p3 = scmp.ne.s32.totalorder %s34_s22, %s1062_s8  ;;  %p1068_p5 = scmp.lt.s32.totalorder %s1062_s8, %s1062_s8 }
   0xe   :  { %p1069_p6 = por %p1068_p5, %p1067_p4 }
  0x10   :  { %p1070_p7 = pnand %p1069_p6, %p1063_p3 }
  0x12   :  { %1073 = shalt.err (!%p1070_p7)
}
  0x13   :  { %36 = dma.hbm_to_vmem [thread:$0]  %s1473_s1, 64, %s34_s22, [#allocation6]  }
  0x14   :  { %s1074_s13 = scalar_lea.hbm %s1472_s0, 1024 }
  0x15   :  { %p1075_p8 = scmp.ne.s32.totalorder %s1472_s0, %s1074_s13  ;;  %p1078_p9 = scmp.lt.u32.totalorder %s1074_s13, %s1472_s0 }
  0x17   :  { %p1080_p10 = pnand %p1078_p9, %p1075_p8 }
  0x19   :  { %1083 = shalt.err (!%p1080_p10)
}
  0x1a   :  { %s1084_s18 = scalar_lea.vmem %s1215_s24, 1024  ;;  %p1089_p12 = scmp.lt.s32.totalorder %s1215_s24, %s1215_s24 }
  0x1b   :  { %p1085_p11 = scmp.ne.s32.totalorder %s1215_s24, %s1084_s18  ;;  %p1090_p13 = scmp.lt.s32.totalorder %s1084_s18, %s1084_s18 }
  0x1d   :  { %p1091_p0 = por %p1090_p13, %p1089_p12 }
  0x1f   :  { %p1092_p1 = pnand %p1091_p0, %p1085_p11 }
  0x21   :  { %1095 = shalt.err (!%p1092_p1)
}
  0x22   :  { %s1172_s1 = smov 64   ;;  %s1173_s19 = smov 4  }
  0x23   :  { %26 = dma.hbm_to_vmem [thread:$0]  %s1472_s0, 1024, %s1215_s24, [#allocation3], %s1172_s1, %s1172_s1, %s1173_s19  }
  0x24   :  { %s1174_s22 = smov [#allocation7]   ;;  %s1175_s25 = smov [#allocation8]  }
  0x25   :  { %s42_s23 = sshll.u32 %s1174_s22, 4  ;;  %s54_s26 = sshll.u32 %s1175_s25, 4  ;;  %s43_s23 = int_to_ptr.vmem [resolvable:$true] %s42_s23  ;;  %s1249_s26 = int_to_ptr.vmem [resolvable:$true] %s54_s26 }
  0x26   :  { %s1096_s29 = scalar_lea.hbm %s1474_s2, 256 }
  0x27   :  { %p1097_p2 = scmp.ne.s32.totalorder %s1474_s2, %s1096_s29  ;;  %p1100_p3 = scmp.lt.u32.totalorder %s1096_s29, %s1474_s2 }
  0x29   :  { %p1102_p4 = pnand %p1100_p3, %p1097_p2 }
  0x2b   :  { %1105 = shalt.err (!%p1102_p4)
}
  0x2c   :  { %s1106_s0 = scalar_lea.vmem %s43_s23, 256  ;;  %p1111_p6 = scmp.lt.s32.totalorder %s43_s23, %s43_s23 }
  0x2d   :  { %p1107_p5 = scmp.ne.s32.totalorder %s43_s23, %s1106_s0  ;;  %p1112_p7 = scmp.lt.s32.totalorder %s1106_s0, %s1106_s0 }
  0x2f   :  { %p1113_p8 = por %p1112_p7, %p1111_p6 }
  0x31   :  { %p1114_p9 = pnand %p1113_p8, %p1107_p5 }
  0x33   :  { %1117 = shalt.err (!%p1114_p9)
}
  0x34   :  { %48 = dma.hbm_to_vmem [thread:$0]  %s1474_s2, 256, %s43_s23, [#allocation6], %s1172_s1, %s1172_s1, %s1173_s19  }
  0x35   :  { %s1118_s13 = scalar_lea.hbm %s1475_s3, 256 }
  0x36   :  { %p1119_p10 = scmp.ne.s32.totalorder %s1475_s3, %s1118_s13  ;;  %p1122_p11 = scmp.lt.u32.totalorder %s1118_s13, %s1475_s3 }
  0x38   :  { %p1124_p12 = pnand %p1122_p11, %p1119_p10 }
  0x3a   :  { %1127 = shalt.err (!%p1124_p12)
}
  0x3b   :  { %s1128_s18 = scalar_lea.vmem %s1249_s26, 256  ;;  %p1133_p0 = scmp.lt.s32.totalorder %s1249_s26, %s1249_s26 }
  0x3c   :  { %p1129_p13 = scmp.ne.s32.totalorder %s1249_s26, %s1128_s18  ;;  %p1134_p1 = scmp.lt.s32.totalorder %s1128_s18, %s1128_s18 }
  0x3e   :  { %p1135_p2 = por %p1134_p1, %p1133_p0 }
  0x40   :  { %p1136_p3 = pnand %p1135_p2, %p1129_p13 }
  0x42   :  { %1139 = shalt.err (!%p1136_p3)
}
  0x43   :  { %60 = dma.hbm_to_vmem [thread:$0]  %s1475_s3, 256, %s1249_s26, [#allocation9], %s1172_s1, %s1172_s1, %s1173_s19  }
  0x44   :  { %1162 = dma.done.wait [#allocation3], 1024  }
  0x45   :  { %1163 = vsyncadd [#allocation3], 4294966272 }
  0x46   :  { %1164 = dma.done.wait [#allocation6], 320  }
  0x47   :  { %1165 = vsyncadd [#allocation6], 4294966976 }
  0x48   :  { %1166 = dma.done.wait [#allocation9], 256  }
  0x49   :  { %1167 = vsyncadd [#allocation9], 4294967040  ;;  %v1176_v0 = vmov 0.0   ;;  %vm1177_vm0 = vmmov 0   ;;  %v988_v1 = vld [vmem:[#allocation8] sm:$0xff]   ;;  %v989_v2 = vld [vmem:[#allocation7] sm:$0xff]   ;;  %v144_v16 = vlaneseq }
  0x4a   :  { %946 = vmatprep.subr.bf16.mxu0 %v1176_v0  ;;  %950 = vmatprep.mubr.msk.bf16.mxu0 %vm1177_vm0, %v1176_v0  ;;  %v990_v3 = vld [vmem:[#allocation8 + $0x8] sm:$0xff]   ;;  %v991_v4 = vld [vmem:[#allocation7 + $0x8] sm:$0xff]   ;;  %vm95_vm1 = vcmask 261120   ;;  %v1178_v14 = vmov 1966171168   ;;  %vm552_vm2 = vcmask 130112  }
  0x4b   :  { %947 = vmatpush3.bf16.msra.mxu0 %v988_v1  ;;  %974 = vmatprep.subr.bf16.mxu1 %v989_v2  ;;  %v1286_v5 = vld [vmem:[#allocation2 + $0x10] sm:$0xff]   ;;  %v1288_v6 = vld [vmem:[#allocation2 + $0x18] sm:$0xff]   ;;  %v1290_v7 = vld [vmem:[#allocation2] sm:$0xff]   ;;  %v142_v15 = vunpack.c.l.s4 %v1178_v14  ;;  %v1320_v18 = vshrl.u32 %v144_v16, 7  ;;  %vm617_vm3 = vcmask 1041409   ;;  %vm619_vm4 = vcmask 1042434  }
  0x4c   :  { %948 = vmatprep.subr.bf16.mxu0 %v1176_v0  ;;  %976 = vmatpush3.bf16.msra.mxu1 %v989_v2  ;;  %v1292_v8 = vld [vmem:[#allocation2 + $0x20] sm:$0xff]   ;;  %v1299_v10 = vld [vmem:[#allocation2 + $0x8] sm:$0xff]   ;;  %v1307_v12 = vld [vmem:[#allocation2 + $0x30] sm:$0xff]   ;;  %vm621_vm5 = vcmask 1043459   ;;  %vm623_vm6 = vcmask 1044484   ;;  %vm625_vm7 = vcmask 1045509  }
  0x4d   :  { %975 = vmatprep.subr.bf16.mxu1 %v991_v4  ;;  %v78_v9 = vld [vmem:[#allocation5] sm:$0xf]  ;;  %962 = vmatprep.mubr.msk.bf16.mxu1 %vm95_vm1, %v1286_v5  ;;  %v1305_v11 = vld [vmem:[#allocation2 + $0x28] sm:$0xff]   ;;  %v1315_v13 = vld [vmem:[#allocation2 + $0x38] sm:$0xff]   ;;  %v143_v17 = vunpack.c.0.s8 %v142_v15  ;;  %v1324_v31 = vsub.s32 0, %v1320_v18  ;;  %vm627_vm8 = vcmask 1046534  }
  0x4e   :  { %v189_v54 = vld [vmem:[%s1476_s4] sm:$0x1]  ;;  %vm629_vm9 = vcmask 1047559   ;;  %vm633_vm11 = vcmask 130048  }
  0x4f   :  { %949 = vmatpush3.bf16.msra.mxu0 %v990_v3  ;;  %v146_v19 = vsub.s32 %v143_v17, %v1320_v18  ;;  %v190_v3 = vunpack.c.l.bf16 %v189_v54 }
  0x50   :  { %954 = vmatprep.subr.bf16.mxu0 %v989_v2  ;;  %977 = vmatpush3.bf16.msra.mxu1 %v991_v4 }
  0x51   :  { %v1337_v15 = vrot.slane %v190_v3, %v1324_v31 }
  0x52   :  { %951 = vmatmul.mubr.msk.bf16.vlgmr.msra.gmra.mrb[0].mxu0 %vm95_vm1, %v78_v9 }
  0x53   :  { %955 = vmatpush3.bf16.msra.mxu0 %v989_v2  ;;  %958 = vmatprep.mubr.msk.bf16.mxu0 %vm95_vm1, %v1290_v7 }
  0x54   :  { %963 = vmatmul.mubr.msk.bf16.vlgmr.msra.gmra.mrb[0].mxu1 %vm95_vm1, %v1288_v6  ;;  %956 = vmatprep.subr.bf16.mxu0 %v991_v4 }
  0x55   :  { %966 = vmatprep.mubr.msk.bf16.mxu1 %vm95_vm1, %v1292_v8 }
  0x57   :  { %957 = vmatpush3.bf16.msra.mxu0 %v991_v4 }
  0x5a   :  { %959 = vmatmul.mubr.msk.bf16.vlgmr.msra.gmra.mrb[4].mxu0 %vm95_vm1, %v1299_v10 }
  0x5c   :  { %967 = vmatmul.mubr.msk.bf16.gmra.mrb[4].mxu1 %vm95_vm1, %v1305_v11 }
  0x5d   :  { %970 = vmatprep.mubr.msk.bf16.mxu1 %vm95_vm1, %v1307_v12 }
  0x64   :  { %971 = vmatmul.mubr.msk.bf16.gmra.mrb[8].mxu1 %vm95_vm1, %v1315_v13 }
 0x125   :  { %v133_v20 = vpop.f32.mrb[0].mxu0 }
 0x126   :  { %v140_v21 = vcombine.high %v133_v20, %v133_v20  ;;  %v147_v22 = vrot.slane %v133_v20, %v146_v19  ;;  %v952_v23 = vpop.f32.mrb[1].mxu0 }
 0x127   :  { %v136_v24 = vpop.f32.mrb[2].mxu0  ;;  %v964_v25 = vpop.f32.mrb[0].mxu1 }
 0x128   :  { %v154_v26 = vrot.slane %v140_v21, %v146_v19  ;;  %v155_v27 = vcombine.high %v147_v22, %v147_v22  ;;  %v163_v28 = vrot.slane %v147_v22, %v146_v19  ;;  %v953_v29 = vpop.f32.mrb[3].mxu0  ;;  %v337_v30 = vpop.f32.mrb[1].mxu1 }
 0x129   :  { %v965_v32 = vpop.f32.mrb[2].mxu1 }
 0x12a   :  { %v156_v33 = vcombine.high %v154_v26, %v154_v26  ;;  %v177_v34 = vrot.slane %v155_v27, %v146_v19  ;;  %v185_v35 = vcombine.high %v163_v28, %v163_v28  ;;  %v340_v36 = vpop.f32.mrb[3].mxu1  ;;  %v170_v37 = vrot.slane %v154_v26, %v146_v19 }
 0x12b   :  { %v387_v43 = vrot.slane %v163_v28, %v1324_v31 }
 0x12c   :  { %v187_v38 = vcombine.high %v177_v34, %v177_v34  ;;  %v395_v39 = vrot.slane %v185_v35, %v1324_v31  ;;  %v391_v40 = vrot.slane %v177_v34, %v1324_v31  ;;  %v184_v41 = vrot.slane %v156_v33, %v146_v19 }
 0x12d   :  { %v960_v42 = vpop.f32.mrb[4].mxu0  ;;  %v403_v53 = vrot.slane %v170_v37, %v1324_v31  ;;  %v186_v9 = vcombine.high %v170_v37, %v170_v37 }
 0x12e   :  { %v399_v44 = vrot.slane %v187_v38, %v1324_v31  ;;  %v428_v45 = vadd.f32 %v395_v39, %v337_v30  ;;  %v426_v46 = vadd.f32 %v960_v42, %v391_v40  ;;  %v429_v47 = vadd.f32 %v395_v39, %v340_v36  ;;  %v321_v48 = vpop.f32.mrb[5].mxu0 }
 0x12f   :  { %v424_v49 = vadd.f32 %v387_v43, %v321_v48  ;;  %v968_v50 = vpop.f32.mrb[4].mxu1  ;;  %v407_v51 = vrot.slane %v184_v41, %v1324_v31  ;;  %v961_v52 = vpop.f32.mrb[6].mxu0  ;;  %v188_v2 = vcombine.high %v184_v41, %v184_v41  ;;  %v411_v19 = vrot.slane %v186_v9, %v1324_v31 }
 0x130   :  { %v430_v55 = vadd.f32 %v964_v25, %v399_v44  ;;  %1008 = vtanh.f32 %v428_v45  ;;  %v431_v56 = vadd.f32 %v965_v32, %v399_v44  ;;  %v427_v57 = vadd.f32 %v961_v52, %v391_v40  ;;  %v353_v58 = vpop.f32.mrb[5].mxu1  ;;  %v324_v59 = vpop.f32.mrb[7].mxu0 }
 0x131   :  { %1010 = vtanh.f32 %v426_v46  ;;  %v434_v60 = vadd.f32 %v968_v50, %v407_v51  ;;  %v432_v61 = vadd.f32 %v403_v53, %v353_v58  ;;  %v425_v62 = vadd.f32 %v387_v43, %v324_v59  ;;  %v969_v63 = vpop.f32.mrb[6].mxu1 }
 0x132   :  { %v435_v0 = vadd.f32 %v969_v63, %v407_v51  ;;  %v356_v1 = vpop.f32.mrb[7].mxu1  ;;  %1012 = vtanh.f32 %v430_v55  ;;  %v415_v14 = vrot.slane %v188_v2, %v1324_v31 }
 0x133   :  { %v433_v4 = vadd.f32 %v403_v53, %v356_v1  ;;  %1014 = vtanh.f32 %v429_v47 }
 0x134   :  { %1016 = vtanh.f32 %v424_v49 }
 0x135   :  { %1018 = vtanh.f32 %v427_v57 }
 0x136   :  { %1020 = vtanh.f32 %v431_v56 }
 0x137   :  { %v972_v17 = vpop.f32.mrb[8].mxu1  ;;  %1022 = vtanh.f32 %v432_v61 }
 0x138   :  { %v438_v20 = vadd.f32 %v972_v17, %v415_v14  ;;  %v369_v21 = vpop.f32.mrb[9].mxu1  ;;  %1024 = vtanh.f32 %v434_v60 }
 0x139   :  { %v436_v22 = vadd.f32 %v411_v19, %v369_v21  ;;  %v973_v23 = vpop.f32.mrb[10].mxu1  ;;  %1026 = vtanh.f32 %v435_v0 }
 0x13a   :  { %v1009_v24 = vpop.eup %1008  ;;  %v439_v25 = vadd.f32 %v973_v23, %v415_v14  ;;  %v372_v26 = vpop.f32.mrb[11].mxu1  ;;  %1028 = vtanh.f32 %v425_v62 }
 0x13b   :  { %v1011_v27 = vpop.eup %1010  ;;  %v437_v28 = vadd.f32 %v411_v19, %v372_v26  ;;  %v464_v29 = vmul.f32 %v1009_v24, %v1337_v15  ;;  %1030 = vtanh.f32 %v433_v4 }
 0x13c   :  { %v462_v30 = vmul.f32 %v1011_v27, %v1337_v15  ;;  %v1013_v32 = vpop.eup %1012  ;;  %1032 = vtanh.f32 %v436_v22 }
 0x13d   :  { %v488_v33 = vsel %vm95_vm1, %v464_v29, 0.0  ;;  %v1015_v34 = vpop.eup %1014  ;;  %v466_v43 = vmul.f32 %v1013_v32, %v1337_v15  ;;  %1034 = vtanh.f32 %v437_v28  ;;  %v1373_v29 = vand.u32 127, %v144_v16 }
 0x13e   :  { %489 = vadd.xlane.f32.xlu0 %v488_v33  ;;  %v482_v35 = vsel %vm95_vm1, %v462_v30, 0.0  ;;  %v1017_v36 = vpop.eup %1016  ;;  %v465_v37 = vmul.f32 %v1015_v34, %v1337_v15  ;;  %1036 = vtanh.f32 %v438_v20 }
 0x13f   :  { %483 = vadd.xlane.f32.xlu1 %v482_v35  ;;  %v460_v38 = vmul.f32 %v1017_v36, %v1337_v15  ;;  %v1019_v39 = vpop.eup %1018  ;;  %v494_v47 = vsel %vm95_vm1, %v466_v43, 0.0  ;;  %1038 = vtanh.f32 %v439_v25  ;;  %v547_v30 = vadd.s32 4294967288, %v1373_v29 }
 0x140   :  { %v1021_v40 = vpop.eup %1020  ;;  %v491_v41 = vsel %vm95_vm1, %v465_v37, 0.0  ;;  %v463_v44 = vmul.f32 %v1019_v39, %v1337_v15  ;;  %v545_v36 = vsub.s32 %v1373_v29, %v1320_v18  ;;  %vm526_vm10 = vcmp.lt.s32.totalorder %v1373_v29, 8 }
 0x141   :  { %v476_v42 = vsel %vm95_vm1, %v460_v38, 0.0  ;;  %v1023_v45 = vpop.eup %1022  ;;  %v467_v50 = vmul.f32 %v1021_v40, %v1337_v15  ;;  %v550_v33 = vsub.s32 %v547_v30, %v1320_v18  ;;  %v673_v30 = vsub.s32 2, %v1320_v18 }
 0x142   :  { %477 = vadd.xlane.f32.xlu0 %v476_v42  ;;  %v1025_v46 = vpop.eup %1024  ;;  %v485_v48 = vsel %vm95_vm1, %v463_v44, 0.0  ;;  %v468_v49 = vmul.f32 %v1023_v45, %v1337_v15  ;;  %vm890_vm12 = vcmp.eq.s32.totalorder %v1373_v29, 1  ;;  %vm888_vm13 = vcmp.eq.s32.totalorder %v1373_v29, 0 }
 0x143   :  { %492 = vadd.xlane.f32.xlu1 %v491_v41  ;;  %v1027_v51 = vpop.eup %1026  ;;  %v497_v54 = vsel %vm95_vm1, %v467_v50, 0.0  ;;  %v470_v55 = vmul.f32 %v1025_v46, %v1337_v15 }
 0x144   :  { %v1029_v52 = vpop.eup %1028  ;;  %v500_v53 = vsel %vm95_vm1, %v468_v49, 0.0  ;;  %v471_v56 = vmul.f32 %v1027_v51, %v1337_v15 }
 0x145   :  { %v1031_v57 = vpop.eup %1030  ;;  %v506_v59 = vsel %vm95_vm1, %v470_v55, 0.0  ;;  %v461_v62 = vmul.f32 %v1029_v52, %v1337_v15 }
 0x146   :  { %495 = vadd.xlane.f32.xlu0 %v494_v47  ;;  %v1033_v58 = vpop.eup %1032  ;;  %v509_v60 = vsel %vm95_vm1, %v471_v56, 0.0  ;;  %v469_v61 = vmul.f32 %v1031_v57, %v1337_v15 }
 0x147   :  { %486 = vadd.xlane.f32.xlu1 %v485_v48  ;;  %v1035_v63 = vpop.eup %1034  ;;  %v479_v2 = vsel %vm95_vm1, %v461_v62, 0.0  ;;  %v472_v4 = vmul.f32 %v1033_v58, %v1337_v15 }
 0x148   :  { %v1037_v0 = vpop.eup %1036  ;;  %v503_v1 = vsel %vm95_vm1, %v469_v61, 0.0  ;;  %v473_v3 = vmul.f32 %v1035_v63, %v1337_v15 }
 0x149   :  { %v1039_v9 = vpop.eup %1038  ;;  %v512_v17 = vsel %vm95_vm1, %v472_v4, 0.0  ;;  %v474_v20 = vmul.f32 %v1037_v0, %v1337_v15 }
 0x14a   :  { %501 = vadd.xlane.f32.xlu0 %v500_v53  ;;  %v515_v14 = vsel %vm95_vm1, %v473_v3, 0.0  ;;  %v475_v19 = vmul.f32 %v1039_v9, %v1337_v15 }
 0x14b   :  { %498 = vadd.xlane.f32.xlu1 %v497_v54  ;;  %v518_v22 = vsel %vm95_vm1, %v474_v20, 0.0 }
 0x14c   :  { %v521_v21 = vsel %vm95_vm1, %v475_v19, 0.0 }
 0x14e   :  { %507 = vadd.xlane.f32.xlu0 %v506_v59 }
 0x14f   :  { %510 = vadd.xlane.f32.xlu1 %v509_v60 }
 0x152   :  { %480 = vadd.xlane.f32.xlu0 %v479_v2 }
 0x153   :  { %504 = vadd.xlane.f32.xlu1 %v503_v1 }
 0x156   :  { %513 = vadd.xlane.f32.xlu0 %v512_v17 }
 0x157   :  { %516 = vadd.xlane.f32.xlu1 %v515_v14 }
 0x15a   :  { %519 = vadd.xlane.f32.xlu0 %v518_v22 }
 0x15b   :  { %522 = vadd.xlane.f32.xlu1 %v521_v21 }
 0x1cb   :  { %v490_v23 = vpop.xlane.xlu0 %489 }
 0x1cc   :  { %v484_v24 = vpop.xlane.xlu1 %483  ;;  %v566_v44 = vrot.slane %v490_v23, %v545_v36 }
 0x1cd   :  { %v557_v16 = vrot.slane %v484_v24, %v545_v36 }
 0x1cf   :  { %v478_v26 = vpop.xlane.xlu0 %477 }
 0x1d0   :  { %v493_v25 = vpop.xlane.xlu1 %492  ;;  %v546_v41 = vrot.slane %v478_v26, %v545_v36 }
 0x1d1   :  { %v570_v38 = vrot.slane %v493_v25, %v550_v33 }
 0x1d3   :  { %v496_v27 = vpop.xlane.xlu0 %495  ;;  %v571_v51 = vsel %vm552_vm2, %v570_v38, %v566_v44  ;;  %v717_v38 = vsub.s32 6, %v1320_v18 }
 0x1d4   :  { %v487_v28 = vpop.xlane.xlu1 %486  ;;  %v575_v45 = vrot.slane %v496_v27, %v545_v36 }
 0x1d5   :  { %v561_v37 = vrot.slane %v487_v28, %v550_v33 }
 0x1d7   :  { %v502_v15 = vpop.xlane.xlu0 %501  ;;  %v562_v47 = vsel %vm552_vm2, %v561_v37, %v557_v16 }
 0x1d8   :  { %v499_v32 = vpop.xlane.xlu1 %498  ;;  %v584_v52 = vrot.slane %v502_v15, %v545_v36 }
 0x1d9   :  { %v579_v42 = vrot.slane %v499_v32, %v550_v33  ;;  %v684_v32 = vsub.s32 3, %v1320_v18 }
 0x1db   :  { %v508_v34 = vpop.xlane.xlu0 %507  ;;  %v580_v56 = vsel %vm552_vm2, %v579_v42, %v575_v45 }
 0x1dc   :  { %v511_v35 = vpop.xlane.xlu1 %510  ;;  %v593_v48 = vrot.slane %v508_v34, %v545_v36  ;;  %v695_v34 = vsub.s32 4, %v1320_v18 }
 0x1dd   :  { %v597_v49 = vrot.slane %v511_v35, %v550_v33 }
 0x1df   :  { %v481_v40 = vpop.xlane.xlu0 %480  ;;  %v598_v62 = vsel %vm552_vm2, %v597_v49, %v593_v48  ;;  %v740_v49 = vunpack.c.h.bf16 %v1299_v10 }
 0x1e0   :  { %v505_v39 = vpop.xlane.xlu1 %504  ;;  %v551_v43 = vrot.slane %v481_v40, %v550_v33 }
 0x1e1   :  { %v588_v46 = vrot.slane %v505_v39, %v550_v33  ;;  %v662_v39 = vsub.s32 1, %v1320_v18 }
 0x1e2   :  { %v553_v50 = vsel %vm552_vm2, %v551_v43, %v546_v41  ;;  %v728_v41 = vsub.s32 7, %v1320_v18 }
 0x1e3   :  { %v618_v53 = vsel %vm617_vm3, %v562_v47, %v553_v50  ;;  %v514_v55 = vpop.xlane.xlu0 %513  ;;  %v589_v60 = vsel %vm552_vm2, %v588_v46, %v584_v52  ;;  %v738_v50 = vunpack.c.h.bf16 %v1290_v7  ;;  %v741_v52 = vunpack.c.l.bf16 %v1286_v5 }
 0x1e4   :  { %v517_v54 = vpop.xlane.xlu1 %516  ;;  %v620_v57 = vsel %vm619_vm4, %v571_v51, %v618_v53  ;;  %v602_v59 = vrot.slane %v514_v55, %v545_v36  ;;  %v739_v51 = vunpack.c.l.bf16 %v1299_v10  ;;  %v744_v10 = vunpack.c.h.bf16 %v1288_v6 }
 0x1e5   :  { %v606_v58 = vrot.slane %v517_v54, %v550_v33  ;;  %v622_v61 = vsel %vm621_vm5, %v580_v56, %v620_v57  ;;  %v737_v54 = vunpack.c.l.bf16 %v1290_v7  ;;  %v742_v56 = vunpack.c.h.bf16 %v1286_v5 }
 0x1e6   :  { %v624_v63 = vsel %vm623_vm6, %v589_v60, %v622_v61 }
 0x1e7   :  { %v607_v0 = vsel %vm552_vm2, %v606_v58, %v602_v59  ;;  %v520_v2 = vpop.xlane.xlu0 %519  ;;  %v626_v3 = vsel %vm625_vm7, %v598_v62, %v624_v63  ;;  %v743_v58 = vunpack.c.l.bf16 %v1288_v6  ;;  %v746_v6 = vunpack.c.h.bf16 %v1292_v8 }
 0x1e8   :  { %v523_v1 = vpop.xlane.xlu1 %522  ;;  %v611_v9 = vrot.slane %v520_v2, %v545_v36  ;;  %v628_v17 = vsel %vm627_vm8, %v607_v0, %v626_v3  ;;  %v706_v36 = vsub.s32 5, %v1320_v18  ;;  %v745_v3 = vunpack.c.l.bf16 %v1292_v8 }
 0x1e9   :  { %v615_v4 = vrot.slane %v523_v1, %v550_v33 }
 0x1eb   :  { %v616_v14 = vsel %vm552_vm2, %v615_v4, %v611_v9 }
 0x1ec   :  { %v630_v19 = vsel %vm629_vm9, %v616_v14, %v628_v17 }
 0x1ed   :  { %v632_v20 = vsel %vm526_vm10, %v630_v19, -1e+30 }
 0x1ee   :  { %v634_v21 = vsel %vm633_vm11, %v632_v20, -inf }
 0x1ef   :  { %635 = vmax.xlane.f32.xlu0 %v634_v21 }
 0x27c   :  { %v1395_v22 = vpop.xlane.xlu0 %635 }
 0x27d   :  { %v637_v23 = vmax.f32 %v1395_v22, -1e+30 }
 0x27f   :  { %v641_v24 = vsub.f32 %v632_v20, %v637_v23  ;;  %v638_v2 = vsub.f32 -1e+30, %v637_v23 }
 0x281   :  { %v642_v25 = vmul.f32 1.442695, %v641_v24  ;;  %v639_v23 = vmul.f32 1.442695, %v638_v2 }
 0x283   :  { %1040 = vpow2.f32 %v642_v25 }
 0x284   :  { %1042 = vpow2.f32 %v639_v23 }
 0x28d   :  { %v1041_v26 = vpop.eup %1040 }
 0x28e   :  { %v645_v27 = vsel %vm633_vm11, %v1041_v26, 0.0  ;;  %v652_v28 = vrot.slane %v1041_v26, %v1324_v31  ;;  %v674_v15 = vrot.slane %v1041_v26, %v673_v30  ;;  %v685_v33 = vrot.slane %v1041_v26, %v684_v32 }
 0x28f   :  { %646 = vadd.xlane.f32.xlu1 %v645_v27  ;;  %v696_v35 = vrot.slane %v1041_v26, %v695_v34  ;;  %v707_v37 = vrot.slane %v1041_v26, %v706_v36  ;;  %v718_v40 = vrot.slane %v1041_v26, %v717_v38  ;;  %v663_v16 = vrot.slane %v1041_v26, %v662_v39 }
 0x290   :  { %654 = vbcast.lane.b32.xlu0 %v652_v28, 256  ;;  %v729_v42 = vrot.slane %v1041_v26, %v728_v41  ;;  %v748_v36 = vunpack.c.h.bf16 %v1305_v11  ;;  %v749_v41 = vunpack.c.l.bf16 %v1307_v12 }
 0x294   :  { %676 = vbcast.lane.b32.xlu0 %v674_v15, 256 }
 0x298   :  { %687 = vbcast.lane.b32.xlu0 %v685_v33, 256 }
 0x29c   :  { %698 = vbcast.lane.b32.xlu0 %v696_v35, 256 }
 0x2a0   :  { %709 = vbcast.lane.b32.xlu0 %v707_v37, 256  ;;  %658 = vbcast.lane.b32.xlu1 %v652_v28, 264  ;;  %v747_v28 = vunpack.c.l.bf16 %v1305_v11 }
 0x2a4   :  { %720 = vbcast.lane.b32.xlu0 %v718_v40, 256  ;;  %665 = vbcast.lane.b32.xlu1 %v663_v16, 256 }
 0x2a8   :  { %731 = vbcast.lane.b32.xlu0 %v729_v42, 256  ;;  %669 = vbcast.lane.b32.xlu1 %v663_v16, 264 }
 0x2ac   :  { %680 = vbcast.lane.b32.xlu1 %v674_v15, 264 }
 0x2b0   :  { %691 = vbcast.lane.b32.xlu1 %v685_v33, 264 }
 0x2b4   :  { %702 = vbcast.lane.b32.xlu1 %v696_v35, 264 }
 0x2b8   :  { %713 = vbcast.lane.b32.xlu1 %v707_v37, 264 }
 0x2bc   :  { %724 = vbcast.lane.b32.xlu1 %v718_v40, 264 }
 0x2c0   :  { %735 = vbcast.lane.b32.xlu1 %v729_v42, 264 }
 0x302   :  { %v655_v43 = vpop.permute.xlu0 %654 }
 0x303   :  { %v753_v63 = vmul.f32 %v737_v54, %v655_v43  ;;  %v751_v54 = vunpack.c.l.bf16 %v1315_v13 }
 0x305   :  { %v769_v21 = vsel %vm95_vm1, %v753_v63, 0.0  ;;  %v752_v63 = vunpack.c.h.bf16 %v1315_v13 }
 0x306   :  { %v677_v45 = vpop.permute.xlu0 %676 }
 0x307   :  { %v757_v61 = vmul.f32 %v741_v52, %v677_v45 }
 0x309   :  { %v787_v14 = vsel %vm95_vm1, %v757_v61, 0.0 }
 0x30a   :  { %v688_v47 = vpop.permute.xlu0 %687 }
 0x30b   :  { %v759_v7 = vmul.f32 %v743_v58, %v688_v47 }
 0x30d   :  { %v796_v26 = vsel %vm95_vm1, %v759_v7, 0.0 }
 0x30e   :  { %v699_v57 = vpop.permute.xlu0 %698 }
 0x30f   :  { %v761_v27 = vmul.f32 %v745_v3, %v699_v57 }
 0x311   :  { %v805_v40 = vsel %vm95_vm1, %v761_v27, 0.0 }
 0x312   :  { %v710_v17 = vpop.permute.xlu0 %709 }
 0x313   :  { %v763_v16 = vmul.f32 %v747_v28, %v710_v17 }
 0x315   :  { %v814_v52 = vsel %vm95_vm1, %v763_v16, 0.0 }
 0x316   :  { %v721_v37 = vpop.permute.xlu0 %720 }
 0x31c   :  { %v1408_v44 = vpop.xlane.xlu1 %646 }
 0x320   :  { %v659_v46 = vpop.permute.xlu1 %658 }
 0x321   :  { %v754_v59 = vmul.f32 %v738_v50, %v659_v46 }
 0x323   :  { %v770_v4 = vsel %vm95_vm1, %v754_v59, 0.0 }
 0x324   :  { %v666_v48 = vpop.permute.xlu1 %665  ;;  %v771_v25 = vadd.f32 %v770_v4, %v769_v21  ;;  %v1043_v4 = vpop.eup %1042 }
 0x325   :  { %v755_v60 = vmul.f32 %v739_v51, %v666_v48  ;;  %v644_v23 = vmul.f32 0.0, %v1043_v4 }
 0x326   :  { %v772_v38 = vrot.slane %v771_v25, 4 }
 0x327   :  { %v778_v5 = vsel %vm95_vm1, %v755_v60, 0.0 }
 0x328   :  { %v670_v53 = vpop.permute.xlu1 %669  ;;  %v773_v50 = vadd.f32 %v772_v38, %v771_v25 }
 0x329   :  { %v756_v55 = vmul.f32 %v740_v49, %v670_v53  ;;  %v750_v49 = vunpack.c.h.bf16 %v1307_v12  ;;  %v765_v53 = vmul.f32 %v749_v41, %v721_v37 }
 0x32a   :  { %v774_v12 = vrot.slane %v773_v50, 2 }
 0x32b   :  { %v779_v0 = vsel %vm95_vm1, %v756_v55, 0.0 }
 0x32c   :  { %v681_v62 = vpop.permute.xlu1 %680  ;;  %v780_v19 = vadd.f32 %v779_v0, %v778_v5  ;;  %v775_v21 = vadd.f32 %v774_v12, %v773_v50 }
 0x32d   :  { %v758_v1 = vmul.f32 %v742_v56, %v681_v62  ;;  %v732_v56 = vpop.permute.xlu0 %731 }
 0x32e   :  { %v781_v15 = vrot.slane %v780_v19, 4  ;;  %v767_v2 = vmul.f32 %v751_v54, %v732_v56 }
 0x32f   :  { %v788_v9 = vsel %vm95_vm1, %v758_v1, 0.0 }
 0x330   :  { %v692_v20 = vpop.permute.xlu1 %691  ;;  %v789_v22 = vadd.f32 %v788_v9, %v787_v14  ;;  %v782_v43 = vadd.f32 %v781_v15, %v780_v19 }
 0x331   :  { %v760_v24 = vmul.f32 %v744_v10, %v692_v20  ;;  %v823_v10 = vsel %vm95_vm1, %v765_v53, 0.0 }
 0x332   :  { %v790_v34 = vrot.slane %v789_v22, 4  ;;  %v783_v57 = vrot.slane %v782_v43, 2 }
 0x333   :  { %v797_v30 = vsel %vm95_vm1, %v760_v24, 0.0 }
 0x334   :  { %v798_v32 = vadd.f32 %v797_v30, %v796_v26  ;;  %v703_v33 = vpop.permute.xlu1 %702  ;;  %v791_v47 = vadd.f32 %v790_v34, %v789_v22  ;;  %v784_v5 = vadd.f32 %v783_v57, %v782_v43  ;;  %v776_v34 = vrot.slane %v775_v21, 1 }
 0x335   :  { %v762_v35 = vmul.f32 %v746_v6, %v703_v33  ;;  %v832_v6 = vsel %vm95_vm1, %v767_v2, 0.0 }
 0x336   :  { %v799_v8 = vrot.slane %v798_v32, 4  ;;  %v792_v61 = vrot.slane %v791_v47, 2  ;;  %v785_v27 = vrot.slane %v784_v5, 1  ;;  %v777_v43 = vadd.f32 %v776_v34, %v775_v21 }
 0x337   :  { %v806_v42 = vsel %vm95_vm1, %v762_v35, 0.0 }
 0x338   :  { %v807_v45 = vadd.f32 %v806_v42, %v805_v40  ;;  %v714_v46 = vpop.permute.xlu1 %713  ;;  %v800_v11 = vadd.f32 %v799_v8, %v798_v32  ;;  %v793_v19 = vadd.f32 %v792_v61, %v791_v47  ;;  %v648_v32 = vadd.f32 %v1408_v44, %v644_v23 }
 0x339   :  { %v764_v48 = vmul.f32 %v748_v36, %v714_v46  ;;  %v786_v8 = vadd.f32 %v785_v27, %v784_v5 }
 0x33a   :  { %v808_v51 = vrot.slane %v807_v45, 4  ;;  %v801_v0 = vrot.slane %v800_v11, 2  ;;  %v794_v33 = vrot.slane %v793_v19, 1  ;;  %1044 = vrcp.f32 %v648_v32 }
 0x33b   :  { %v815_v55 = vsel %vm95_vm1, %v764_v48, 0.0 }
 0x33c   :  { %v809_v58 = vadd.f32 %v808_v51, %v807_v45  ;;  %v816_v59 = vadd.f32 %v815_v55, %v814_v52  ;;  %v725_v60 = vpop.permute.xlu1 %724  ;;  %v802_v22 = vadd.f32 %v801_v0, %v800_v11  ;;  %v795_v42 = vadd.f32 %v794_v33, %v793_v19  ;;  %v860_v11 = vld [vmem:[%s1477_s5] sm:$0x1]  ;;  %s1179_s5 = smov [#allocation10]  }
 0x33d   :  { %v766_v62 = vmul.f32 %v750_v49, %v725_v60  ;;  %v849_v49 = vsel %vm617_vm3, %v786_v8, %v777_v43  ;;  %v861_v56 = vunpack.c.l.bf16 %v860_v11  ;;  %s901_s21 = sshll.u32 %s1179_s5, 4  ;;  %s902_s21 = int_to_ptr.vmem [resolvable:$true] %s901_s21 }
 0x33e   :  { %v817_v1 = vrot.slane %v816_v59, 4  ;;  %v810_v3 = vrot.slane %v809_v58, 2  ;;  %v803_v35 = vrot.slane %v802_v22, 1  ;;  %v850_v51 = vsel %vm619_vm4, %v795_v42, %v849_v49  ;;  %s1140_s22 = scalar_lea.vmem %s902_s21, 128  ;;  %p1145_p5 = scmp.lt.s32.totalorder %s902_s21, %s902_s21 }
 0x33f   :  { %v824_v7 = vsel %vm95_vm1, %v766_v62, 0.0  ;;  %v865_v12 = vrot.slane %v861_v56, %v1324_v31  ;;  %p1141_p4 = scmp.ne.s32.totalorder %s902_s21, %s1140_s22  ;;  %p1146_p6 = scmp.lt.s32.totalorder %s1140_s22, %s1140_s22 }
 0x340   :  { %v818_v9 = vadd.f32 %v817_v1, %v816_v59  ;;  %v825_v14 = vadd.f32 %v824_v7, %v823_v10  ;;  %v736_v17 = vpop.permute.xlu1 %735  ;;  %v811_v25 = vadd.f32 %v810_v3, %v809_v58  ;;  %v804_v45 = vadd.f32 %v803_v35, %v802_v22 }
 0x341   :  { %v768_v20 = vmul.f32 %v752_v63, %v736_v17  ;;  %v873_v63 = vrot.slane %v861_v56, %v662_v39  ;;  %p1147_p7 = por %p1146_p6, %p1145_p5 }
 0x342   :  { %v819_v24 = vrot.slane %v818_v9, 2  ;;  %v826_v13 = vrot.slane %v825_v14, 4  ;;  %v812_v38 = vrot.slane %v811_v25, 1  ;;  %v851_v53 = vsel %vm621_vm5, %v804_v45, %v850_v51 }
 0x343   :  { %v833_v26 = vsel %vm95_vm1, %v768_v20, 0.0  ;;  %p1148_p8 = pnand %p1147_p7, %p1141_p4 }
 0x344   :  { %v820_v28 = vadd.f32 %v819_v24, %v818_v9  ;;  %v827_v30 = vadd.f32 %v826_v13, %v825_v14  ;;  %v834_v15 = vadd.f32 %v833_v26, %v832_v6  ;;  %v813_v48 = vadd.f32 %v812_v38, %v811_v25  ;;  %v1045_v61 = vpop.eup %1044 }
 0x346   :  { %v828_v36 = vrot.slane %v827_v30, 2  ;;  %v835_v37 = vrot.slane %v834_v15, 4  ;;  %v821_v40 = vrot.slane %v820_v28, 1  ;;  %v852_v55 = vsel %vm623_vm6, %v813_v48, %v851_v53 }
 0x348   :  { %v829_v16 = vadd.f32 %v828_v36, %v827_v30  ;;  %v836_v41 = vadd.f32 %v835_v37, %v834_v15  ;;  %v822_v44 = vadd.f32 %v821_v40, %v820_v28 }
 0x34a   :  { %v830_v46 = vrot.slane %v829_v16, 1  ;;  %v837_v47 = vrot.slane %v836_v41, 2  ;;  %v853_v58 = vsel %vm625_vm7, %v822_v44, %v852_v55 }
 0x34c   :  { %v838_v50 = vadd.f32 %v837_v47, %v836_v41  ;;  %v831_v52 = vadd.f32 %v830_v46, %v829_v16 }
 0x34e   :  { %v839_v54 = vrot.slane %v838_v50, 1  ;;  %v854_v59 = vsel %vm627_vm8, %v831_v52, %v853_v58 }
 0x350   :  { %v840_v57 = vadd.f32 %v839_v54, %v838_v50 }
 0x352   :  { %v855_v60 = vsel %vm629_vm9, %v840_v57, %v854_v59 }
 0x353   :  { %v857_v62 = vadd.f32 %v855_v60, %v644_v23 }
 0x355   :  { %v859_v0 = vmul.f32 %v1045_v61, %v857_v62 }
 0x357   :  { %v874_v1 = vmul.f32 %v873_v63, %v859_v0  ;;  %v866_v10 = vmul.f32 %v865_v12, %v859_v0 }
 0x359   :  { %v875_v2 = vsel %vm95_vm1, %v874_v1, 0.0  ;;  %v867_v3 = vsel %vm95_vm1, %v866_v10, 0.0 }
 0x35a   :  { %876 = vadd.xlane.f32.xlu1 %v875_v2  ;;  %868 = vadd.xlane.f32.xlu0 %v867_v3 }
 0x3e7   :  { %v877_v7 = vpop.xlane.xlu1 %876  ;;  %v869_v4 = vpop.xlane.xlu0 %868 }
 0x3e8   :  { %v878_v5 = vmax.f32 %v869_v4, %v877_v7 }
 0x3ea   :  { %v879_v9 = vsub.f32 %v869_v4, %v878_v5  ;;  %v882_v14 = vsub.f32 %v877_v7, %v878_v5 }
 0x3ec   :  { %v880_v17 = vmul.f32 1.442695, %v879_v9  ;;  %v883_v19 = vmul.f32 1.442695, %v882_v14 }
 0x3ee   :  { %1046 = vpow2.f32 %v880_v17 }
 0x3ef   :  { %1048 = vpow2.f32 %v883_v19 }
 0x3f8   :  { %v1047_v18 = vpop.eup %1046 }
 0x3f9   :  { %v1049_v31 = vpop.eup %1048 }
 0x3fa   :  { %v885_v39 = vadd.f32 %v1049_v31, %v1047_v18 }
 0x3fc   :  { %1050 = vrcp.f32 %v885_v39 }
 0x406   :  { %v1051_v20 = vpop.eup %1050 }
 0x407   :  { %v889_v21 = vmul.f32 %v1051_v20, %v1047_v18  ;;  %v891_v22 = vmul.f32 %v1051_v20, %v1049_v31 }
 0x409   :  { %v892_v24 = vsel %vm890_vm12, %v891_v22, 0.0 }
 0x40a   :  { %v893_v13 = vsel %vm888_vm13, %v889_v21, %v892_v24 }
 0x40b   :  { %894 = vst [vmem:[#allocation10] sm:$0xff] %v893_v13 }
 0x40c   :  { %1151 = shalt.err (!%p1148_p8)
}
 0x40d   :  { %s1152_s26 = scalar_lea.hbm %s1478_s6, 128 }
 0x40e   :  { %p1153_p9 = scmp.ne.s32.totalorder %s1478_s6, %s1152_s26  ;;  %p1156_p10 = scmp.lt.u32.totalorder %s1152_s26, %s1478_s6 }
 0x410   :  { %p1158_p11 = pnand %p1156_p10, %p1153_p9 }
 0x412   :  { %1161 = shalt.err (!%p1158_p11)
}
 0x413   :  { %904 = dma.vmem_to_hbm [thread:$0]  %s902_s21, 128, %s1478_s6, [#allocation4]  }
 0x414   :  { %1168 = dma.done.wait [#allocation4], 128  }
 0x415   :  { %1169 = vsyncadd [#allocation4], 4294967168 }
 0x416   :  { %908 = vsyncpa [#allocation3], 1 }
 0x417   :  { %909 = vsyncpa [#allocation6], 1 }
 0x418   :  { %910 = vsyncpa [#allocation9], 1 }
 0x419   :  { %911 = vsyncpa [#allocation4], 1 }

</bundles_post_ra>
